<compile_context>
chip_gen: v6e
topology: v6e:2x2x1
jax: 0.10.0
libtpu: 0.0.40
codegen_flags: <defaults>
</compile_context>

<pallas_src>
import jax
import jax.numpy as jnp
from jax.experimental import pallas as pl
from jax.experimental.pallas import tpu as pltpu

# ---------------- problem sizes (small, consistent with the module) ----------------
B = 2            # batch
CIN = 3          # image channels (torchvision backbones expect 3)
H = W = 16       # spatial
HW = H * W
KH = KW = 3      # conv kernel
COUT = 32        # backbone conv channels
NCLS = 1000      # backbone output ("img" logits), AutoEncoder input_size=1000
HAE = 128        # AutoEncoder hidden size

KPATCH = KH * KW * CIN   # 27  (im2col contraction dim)
KPAD = 32                # padded contraction dim (sublane friendly)
NPAD = 1024              # 1000 padded to a multiple of 128 (lane dense)

# advisory cost estimate (flops of the 5 matmuls, bytes of all VMEM-resident operands)
_FLOPS = 2 * (B * HW * KPAD * COUT + B * (B * HW) * COUT
              + B * COUT * NPAD + B * NPAD * HAE + B * HAE * NPAD)
_BYTES = (B * HW * KPAD * 4 + B * (B * HW) * 4 + KPAD * COUT * 4 + COUT * 4
          + COUT * NPAD * 4 + NPAD * 4 + NPAD * HAE * 2 + HAE * 4
          + HAE * NPAD * 2 + NPAD * 4 + B * NPAD * 4 + B * HAE * 4 + B * NPAD * 4)
_TRANSCENDENTALS = B * NPAD   # sigmoid on the decode logits


# -------- single fused kernel: conv(matmul) + GAP(matmul) + fc + encode/decode ------
def eae_fused_kernel(patch_ref, avg_ref, wc_ref, bc_ref, wfc_ref, bfc_ref,
                     we_ref, be_ref, wd_ref, bd_ref,
                     img_ref, enc_ref, dec_ref):
    # patch_ref: (B*H*W, KPAD) f32   im2col patches (zero-padded K), column order (c,kh,kw)
    # avg_ref:   (B, B*H*W)    f32   block-diagonal 1/HW averaging matrix (GAP as matmul)
    # wc_ref:    (KPAD, COUT)  f32   flattened conv weight (zero-padded K)
    # bc_ref:    (1, COUT)     f32
    # wfc_ref:   (COUT, NPAD)  f32   fc head weight (zero-padded N)
    # bfc_ref:   (1, NPAD)     f32
    # we_ref:    (NPAD, HAE)   bf16  encoder weight (zero-padded K)
    # be_ref:    (1, HAE)      f32
    # wd_ref:    (HAE, NPAD)   bf16  decoder weight (zero-padded N)
    # bd_ref:    (1, NPAD)     f32
    # img_ref:   (B, NPAD)  enc_ref: (B, HAE)  dec_ref: (B, NPAD)

    # conv3x3(pad=1) + bias + ReLU as one im2col matmul on the MXU
    conv = jnp.dot(patch_ref[...], wc_ref[...],
                   preferred_element_type=jnp.float32)            # (B*H*W, COUT)
    conv = jnp.maximum(conv + bc_ref[...], 0.0)

    # global average pool per batch element as an MXU matmul (no XLU reduction/concat)
    feat = jnp.dot(avg_ref[...], conv,
                   preferred_element_type=jnp.float32)            # (B, COUT)

    # backbone fc head -> "img" logits (full f32 path)
    img = jnp.dot(feat, wfc_ref[...],
                  preferred_element_type=jnp.float32) + bfc_ref[...]   # (B, NPAD)
    img_ref[...] = img

    # AutoEncoder encode: relu(Linear(1000->128)); bf16 operands, f32 accumulation
    enc = jnp.maximum(
        jnp.dot(img.astype(jnp.bfloat16), we_ref[...],
                preferred_element_type=jnp.float32) + be_ref[...], 0.0)
    enc_ref[...] = enc                                                  # (B, HAE)

    # AutoEncoder decode: sigmoid(Linear(128->1000)); bf16 operands, f32 accumulation
    dec_logits = jnp.dot(enc.astype(jnp.bfloat16), wd_ref[...],
                         preferred_element_type=jnp.float32) + bd_ref[...]
    # NOTE: padded columns 1000:1023 evaluate sigmoid(0)=0.5; the wrapper slices them off.
    dec_ref[...] = jax.nn.sigmoid(dec_logits)                           # (B, NPAD)


def eae_fused(patches, avg_mat, wc, bc, wfc, bfc, we, be, wd, bd):
    vmem = pl.BlockSpec(memory_space=pltpu.MemorySpace.VMEM)    # full array, VMEM resident
    return pl.pallas_call(
        eae_fused_kernel,
        out_shape=(
            jax.ShapeDtypeStruct((B, NPAD), jnp.float32),   # img (padded)
            jax.ShapeDtypeStruct((B, HAE), jnp.float32),    # encode
            jax.ShapeDtypeStruct((B, NPAD), jnp.float32),   # decode (padded)
        ),
        in_specs=[vmem] * 10,
        out_specs=(vmem, vmem, vmem),
        cost_estimate=pl.CostEstimate(flops=_FLOPS,
                                      bytes_accessed=_BYTES,
                                      transcendentals=_TRANSCENDENTALS),
    )(patches, avg_mat, wc, bc, wfc, bfc, we, be, wd, bd)


# ---------------- XLA-side glue: one-HLO im2col + one-time weight padding ------------
def extract_patches(x_nchw):
    """im2col in a single conv HLO (identity kernel); exact gather, no 9-slice chain."""
    x_nhwc = jnp.transpose(x_nchw, (0, 2, 3, 1))                 # NCHW -> NHWC (tiny, 6 KB)
    patches = jax.lax.conv_general_dilated_patches(
        x_nhwc, filter_shape=(KH, KW), window_strides=(1, 1),
        padding=((1, 1), (1, 1)),
        dimension_numbers=("NHWC", "HWIO", "NHWC"),
        precision=jax.lax.Precision.HIGHEST)                     # (B, H, W, CIN*KH*KW)
    patches = patches.reshape(B * H * W, KPATCH)                 # column order = (c, kh, kw)
    return jnp.pad(patches, ((0, 0), (0, KPAD - KPATCH)))        # (B*H*W, KPAD)


def pad_params(p):
    """One-time reshape/zero-pad of raw params into lane-aligned kernel shapes."""
    # conv_general_dilated_patches orders patch columns as (c, kh, kw) -> match it here.
    wc = jnp.transpose(p["w_conv"], (2, 0, 1, 3)).reshape(KPATCH, COUT)
    wc = jnp.pad(wc, ((0, KPAD - KPATCH), (0, 0)))               # (KPAD, COUT)
    # block-diagonal averaging matrix: row b has 1/HW over columns [b*HW, (b+1)*HW)
    avg = jnp.repeat(jnp.eye(B, dtype=jnp.float32), HW, axis=1) / HW   # (B, B*HW)
    return {
        "avg_pool": avg,
        "w_conv": wc,
        "b_conv": p["b_conv"],                                                 # (1, COUT)
        "w_fc":  jnp.pad(p["w_fc"],  ((0, 0), (0, NPAD - NCLS))),              # (COUT, NPAD)
        "b_fc":  jnp.pad(p["b_fc"],  ((0, 0), (0, NPAD - NCLS))),              # (1, NPAD)
        # bf16 storage for the two ~0.5 MB weights (dominant DMA); f32 accumulation in-kernel
        "w_enc": jnp.pad(p["w_enc"], ((0, NPAD - NCLS), (0, 0))).astype(jnp.bfloat16),
        "b_enc": p["b_enc"],                                                   # (1, HAE)
        "w_dec": jnp.pad(p["w_dec"], ((0, 0), (0, NPAD - NCLS))).astype(jnp.bfloat16),
        "b_dec": jnp.pad(p["b_dec"], ((0, 0), (0, NPAD - NCLS))),              # (1, NPAD)
    }


# ---------------- full forward (matches EAE.forward: returns (img, encode, decode)) --
@jax.jit
def eae_forward(x_nchw, pp):
    patches = extract_patches(x_nchw)
    img_p, encode, dec_p = eae_fused(
        patches, pp["avg_pool"],
        pp["w_conv"], pp["b_conv"],
        pp["w_fc"], pp["b_fc"],
        pp["w_enc"], pp["b_enc"],
        pp["w_dec"], pp["b_dec"])
    return img_p[:, :NCLS], encode, dec_p[:, :NCLS]             # strip lane padding


# ---------------- pure-JAX f32 reference for a sanity check --------------------------
def eae_reference(x_nchw, p):
    x = jnp.transpose(x_nchw, (0, 2, 3, 1))
    xp = jnp.pad(x, ((0, 0), (1, 1), (1, 1), (0, 0)))
    conv = jax.lax.conv_general_dilated(
        xp, p["w_conv"], window_strides=(1, 1), padding="VALID",
        dimension_numbers=("NHWC", "HWIO", "NHWC"))
    conv = jnp.maximum(conv + p["b_conv"][0], 0.0)
    feat = jnp.mean(conv.reshape(B, H * W, COUT), axis=1)
    img = feat @ p["w_fc"] + p["b_fc"][0]
    enc = jnp.maximum(img @ p["w_enc"] + p["b_enc"][0], 0.0)
    dec = jax.nn.sigmoid(enc @ p["w_dec"] + p["b_dec"][0])
    return img, enc, dec


def init_params(key):
    ks = jax.random.split(key, 8)
    scale = 0.05
    return {
        "w_conv": scale * jax.random.normal(ks[0], (KH, KW, CIN, COUT), jnp.float32),
        "b_conv": scale * jax.random.normal(ks[1], (1, COUT), jnp.float32),
        "w_fc":   scale * jax.random.normal(ks[2], (COUT, NCLS), jnp.float32),
        "b_fc":   scale * jax.random.normal(ks[3], (1, NCLS), jnp.float32),
        "w_enc":  scale * jax.random.normal(ks[4], (NCLS, HAE), jnp.float32),
        "b_enc":  scale * jax.random.normal(ks[5], (1, HAE), jnp.float32),
        "w_dec":  scale * jax.random.normal(ks[6], (HAE, NCLS), jnp.float32),
        "b_dec":  scale * jax.random.normal(ks[7], (1, NCLS), jnp.float32),
    }


if __name__ == "__main__":
    key = jax.random.PRNGKey(0)
    kx, kp = jax.random.split(key)
    x = jax.random.normal(kx, (B, CIN, H, W), jnp.float32)   # NCHW, like PyTorch
    params = init_params(kp)
    padded = pad_params(params)                              # one-time weight prep

    img, encode, decode = jax.block_until_ready(eae_forward(x, padded))

    img_r, enc_r, dec_r = eae_reference(x, params)
    assert img.shape == (B, NCLS) and encode.shape == (B, HAE) and decode.shape == (B, NCLS)
    # img path is all-f32: tight check
    assert jnp.allclose(img, img_r, atol=1e-4, rtol=1e-4)
    # encode/decode use bf16-stored weights (DMA-halving optimization) with f32 accumulation;
    # expected deviation from the f32 reference is ~1e-3, so check at 1e-2.
    assert jnp.allclose(encode, enc_r, atol=1e-2, rtol=1e-2)
    assert jnp.allclose(decode, dec_r, atol=1e-2, rtol=1e-2)

    print("KERNEL_OK")
</pallas_src>

<mosaic_0001>
module attributes {stable_mosaic.version = 11 : i64} {
  func.func @eae_fused_kernel(%arg0: memref<512x32xf32, #tpu.memory_space<vmem>>, %arg1: memref<2x512xf32, #tpu.memory_space<vmem>>, %arg2: memref<32x32xf32, #tpu.memory_space<vmem>>, %arg3: memref<1x32xf32, #tpu.memory_space<vmem>>, %arg4: memref<32x1024xf32, #tpu.memory_space<vmem>>, %arg5: memref<1x1024xf32, #tpu.memory_space<vmem>>, %arg6: memref<1024x128xbf16, #tpu.memory_space<vmem>>, %arg7: memref<1x128xf32, #tpu.memory_space<vmem>>, %arg8: memref<128x1024xbf16, #tpu.memory_space<vmem>>, %arg9: memref<1x1024xf32, #tpu.memory_space<vmem>>, %arg10: memref<2x1024xf32, #tpu.memory_space<vmem>>, %arg11: memref<2x128xf32, #tpu.memory_space<vmem>>, %arg12: memref<2x1024xf32, #tpu.memory_space<vmem>>) attributes {dimension_semantics = [], scalar_prefetch = 0 : i64, scratch_operands = 0 : i64, tpu.core_type = #tpu.core_type<tc>} {
    %c0 = arith.constant 0 : index
    %c0_0 = arith.constant 0 : index
    %0 = vector.load %arg0[%c0, %c0_0] : memref<512x32xf32, #tpu.memory_space<vmem>>, vector<512x32xf32>
    %c0_1 = arith.constant 0 : index
    %c0_2 = arith.constant 0 : index
    %1 = vector.load %arg2[%c0_1, %c0_2] : memref<32x32xf32, #tpu.memory_space<vmem>>, vector<32x32xf32>
    %cst = arith.constant dense<0.000000e+00> : vector<512x32xf32>
    %2 = tpu.matmul %0, %1, %cst {dimension_numbers = #tpu.dot_dimension_numbers<[1], [0], [0], [1], [0, 0, 1, 1], [], []>} : vector<512x32xf32>, vector<32x32xf32>, vector<512x32xf32> -> vector<512x32xf32>
    %c0_3 = arith.constant 0 : index
    %c0_4 = arith.constant 0 : index
    %3 = vector.load %arg3[%c0_3, %c0_4] : memref<1x32xf32, #tpu.memory_space<vmem>>, vector<1x32xf32>
    %4 = vector.broadcast %3 : vector<1x32xf32> to vector<512x32xf32>
    %5 = arith.addf %2, %4 : vector<512x32xf32>
    %cst_5 = arith.constant 0.000000e+00 : f32
    %6 = vector.broadcast %cst_5 : f32 to vector<512x32xf32>
    %7 = arith.maximumf %5, %6 : vector<512x32xf32>
    %c0_6 = arith.constant 0 : index
    %c0_7 = arith.constant 0 : index
    %8 = vector.load %arg1[%c0_6, %c0_7] : memref<2x512xf32, #tpu.memory_space<vmem>>, vector<2x512xf32>
    %cst_8 = arith.constant dense<0.000000e+00> : vector<2x32xf32>
    %9 = tpu.matmul %8, %7, %cst_8 {dimension_numbers = #tpu.dot_dimension_numbers<[1], [0], [0], [1], [0, 0, 1, 1], [], []>} : vector<2x512xf32>, vector<512x32xf32>, vector<2x32xf32> -> vector<2x32xf32>
    %c0_9 = arith.constant 0 : index
    %c0_10 = arith.constant 0 : index
    %10 = vector.load %arg4[%c0_9, %c0_10] : memref<32x1024xf32, #tpu.memory_space<vmem>>, vector<32x1024xf32>
    %cst_11 = arith.constant dense<0.000000e+00> : vector<2x1024xf32>
    %11 = tpu.matmul %9, %10, %cst_11 {dimension_numbers = #tpu.dot_dimension_numbers<[1], [0], [0], [1], [0, 0, 1, 1], [], []>} : vector<2x32xf32>, vector<32x1024xf32>, vector<2x1024xf32> -> vector<2x1024xf32>
    %c0_12 = arith.constant 0 : index
    %c0_13 = arith.constant 0 : index
    %12 = vector.load %arg5[%c0_12, %c0_13] : memref<1x1024xf32, #tpu.memory_space<vmem>>, vector<1x1024xf32>
    %13 = vector.broadcast %12 : vector<1x1024xf32> to vector<2x1024xf32>
    %14 = arith.addf %11, %13 : vector<2x1024xf32>
    %c0_14 = arith.constant 0 : index
    %c0_15 = arith.constant 0 : index
    %15 = vector.load %arg10[%c0_14, %c0_15] : memref<2x1024xf32, #tpu.memory_space<vmem>>, vector<2x1024xf32>
    tpu.vector_store %arg10[%c0_14, %c0_15], %14 {strides = array<i32>} : memref<2x1024xf32, #tpu.memory_space<vmem>>, vector<2x1024xf32>,
    %16 = arith.truncf %14 : vector<2x1024xf32> to vector<2x1024xbf16>
    %c0_16 = arith.constant 0 : index
    %c0_17 = arith.constant 0 : index
    %17 = vector.load %arg6[%c0_16, %c0_17] : memref<1024x128xbf16, #tpu.memory_space<vmem>>, vector<1024x128xbf16>
    %cst_18 = arith.constant dense<0.000000e+00> : vector<2x128xf32>
    %18 = tpu.matmul %16, %17, %cst_18 {dimension_numbers = #tpu.dot_dimension_numbers<[1], [0], [0], [1], [0, 0, 1, 1], [], []>} : vector<2x1024xbf16>, vector<1024x128xbf16>, vector<2x128xf32> -> vector<2x128xf32>
    %c0_19 = arith.constant 0 : index
    %c0_20 = arith.constant 0 : index
    %19 = vector.load %arg7[%c0_19, %c0_20] : memref<1x128xf32, #tpu.memory_space<vmem>>, vector<1x128xf32>
    %20 = vector.broadcast %19 : vector<1x128xf32> to vector<2x128xf32>
    %21 = arith.addf %18, %20 : vector<2x128xf32>
    %cst_21 = arith.constant 0.000000e+00 : f32
    %22 = vector.broadcast %cst_21 : f32 to vector<2x128xf32>
    %23 = arith.maximumf %21, %22 : vector<2x128xf32>
    %c0_22 = arith.constant 0 : index
    %c0_23 = arith.constant 0 : index
    %24 = vector.load %arg11[%c0_22, %c0_23] : memref<2x128xf32, #tpu.memory_space<vmem>>, vector<2x128xf32>
    tpu.vector_store %arg11[%c0_22, %c0_23], %23 {strides = array<i32>} : memref<2x128xf32, #tpu.memory_space<vmem>>, vector<2x128xf32>,
    %25 = arith.truncf %23 : vector<2x128xf32> to vector<2x128xbf16>
    %c0_24 = arith.constant 0 : index
    %c0_25 = arith.constant 0 : index
    %26 = vector.load %arg8[%c0_24, %c0_25] : memref<128x1024xbf16, #tpu.memory_space<vmem>>, vector<128x1024xbf16>
    %cst_26 = arith.constant dense<0.000000e+00> : vector<2x1024xf32>
    %27 = tpu.matmul %25, %26, %cst_26 {dimension_numbers = #tpu.dot_dimension_numbers<[1], [0], [0], [1], [0, 0, 1, 1], [], []>} : vector<2x128xbf16>, vector<128x1024xbf16>, vector<2x1024xf32> -> vector<2x1024xf32>
    %c0_27 = arith.constant 0 : index
    %c0_28 = arith.constant 0 : index
    %28 = vector.load %arg9[%c0_27, %c0_28] : memref<1x1024xf32, #tpu.memory_space<vmem>>, vector<1x1024xf32>
    %29 = vector.broadcast %28 : vector<1x1024xf32> to vector<2x1024xf32>
    %30 = arith.addf %27, %29 : vector<2x1024xf32>
    %31 = arith.negf %30 : vector<2x1024xf32>
    %32 = math.exp %31 : vector<2x1024xf32>
    %cst_29 = arith.constant 1.000000e+00 : f32
    %33 = vector.broadcast %cst_29 : f32 to vector<2x1024xf32>
    %34 = arith.addf %33, %32 : vector<2x1024xf32>
    %35 = arith.divf %33, %34 : vector<2x1024xf32>
    %c0_30 = arith.constant 0 : index
    %c0_31 = arith.constant 0 : index
    %36 = vector.load %arg12[%c0_30, %c0_31] : memref<2x1024xf32, #tpu.memory_space<vmem>>, vector<2x1024xf32>
    tpu.vector_store %arg12[%c0_30, %c0_31], %35 {strides = array<i32>} : memref<2x1024xf32, #tpu.memory_space<vmem>>, vector<2x1024xf32>,
    return
  }
}

</mosaic_0001>

<bundles_post_ra>
// kernel: eae_forward.1
= control target key start
LH: loop header
LB: loop body
LE: loop exit
PB: predicated region body
PF: predicated region fallthrough
CT: control target
= control target key end

     0   :  { %18 = vsyncpa [#allocation3], 0  ;;  %vm116_vm0 = vcmask 261120   ;;  %s4545_s0 = inlined_call_operand.vmem [shape: f32[512,32], index: 0, kind: input, shape index: {}]   ;;  %s4546_s1 = inlined_call_operand.vmem [shape: f32[2,512], index: 1, kind: input, shape index: {}]   ;;  %s4547_s2 = inlined_call_operand.vmem [shape: f32[32,32], index: 2, kind: input, shape index: {}]   ;;  %s4548_s3 = inlined_call_operand.vmem [shape: f32[1,32], index: 3, kind: input, shape index: {}]   ;;  %s4549_s4 = inlined_call_operand.vmem [shape: f32[32,1024], index: 4, kind: input, shape index: {}]   ;;  %s4550_s5 = inlined_call_operand.vmem [shape: f32[1,1024], index: 5, kind: input, shape index: {}]   ;;  %s4551_s6 = inlined_call_operand.vmem [shape: bf16[1024,128], index: 6, kind: input, shape index: {}]   ;;  %s4552_s7 = inlined_call_operand.vmem [shape: f32[1,128], index: 7, kind: input, shape index: {}]   ;;  %s4553_s8 = inlined_call_operand.vmem [shape: bf16[128,1024], index: 8, kind: input, shape index: {}]   ;;  %s4554_s9 = inlined_call_operand.vmem [shape: f32[1,1024], index: 9, kind: input, shape index: {}]   ;;  %s4555_s10 = inlined_call_operand.hbm [shape: f32[2,1024], index: 10, kind: output, shape index: {0}]   ;;  %s4556_s11 = inlined_call_operand.hbm [shape: f32[2,128], index: 11, kind: output, shape index: {1}]   ;;  %s4557_s12 = inlined_call_operand.hbm [shape: f32[2,1024], index: 12, kind: output, shape index: {2}]  }
   0x1   :  { %v108_v0 = vld [vmem:[%s4547_s2 + $0x18] sm:$0xff]  ;;  %v107_v1 = vld [vmem:[%s4547_s2 + $0x10] sm:$0xff]  ;;  %v41_v2 = vld [vmem:[%s4545_s0] sm:$0xff] }
   0x2   :  { %3175 = vmatprep.subr.mxu0 %v108_v0  ;;  %v106_v3 = vld [vmem:[%s4547_s2 + $0x8] sm:$0xff]  ;;  %3183 = vmatprep.mubr.msk.f32.mxu0 %vm116_vm0, %v41_v2  ;;  %v105_v4 = vld [vmem:[%s4547_s2] sm:$0xff]  ;;  %v43_v6 = vld [vmem:[%s4545_s0 + $0x10] sm:$0xff] }
   0x3   :  { %3176 = vmatpush3.msra.mxu0 %v108_v0  ;;  %v42_v5 = vld [vmem:[%s4545_s0 + $0x8] sm:$0xff]  ;;  %v44_v7 = vld [vmem:[%s4545_s0 + $0x18] sm:$0xff]  ;;  %v45_v8 = vld [vmem:[%s4545_s0 + $0x20] sm:$0xff] }
   0x4   :  { %3177 = vmatprep.subr.mxu0 %v107_v1  ;;  %v46_v9 = vld [vmem:[%s4545_s0 + $0x28] sm:$0xff]  ;;  %v47_v10 = vld [vmem:[%s4545_s0 + $0x30] sm:$0xff]  ;;  %v48_v11 = vld [vmem:[%s4545_s0 + $0x38] sm:$0xff] }
   0x5   :  { %3178 = vmatpush3.msra.mxu0 %v107_v1  ;;  %v49_v12 = vld [vmem:[%s4545_s0 + $0x40] sm:$0xff]  ;;  %v50_v13 = vld [vmem:[%s4545_s0 + $0x48] sm:$0xff]  ;;  %v51_v14 = vld [vmem:[%s4545_s0 + $0x50] sm:$0xff] }
   0x6   :  { %3179 = vmatprep.subr.mxu0 %v106_v3  ;;  %v52_v15 = vld [vmem:[%s4545_s0 + $0x58] sm:$0xff]  ;;  %v53_v16 = vld [vmem:[%s4545_s0 + $0x60] sm:$0xff]  ;;  %v54_v17 = vld [vmem:[%s4545_s0 + $0x68] sm:$0xff] }
   0x7   :  { %3180 = vmatpush3.msra.mxu0 %v106_v3  ;;  %v55_v18 = vld [vmem:[%s4545_s0 + $0x70] sm:$0xff]  ;;  %v56_v19 = vld [vmem:[%s4545_s0 + $0x78] sm:$0xff]  ;;  %v57_v20 = vld [vmem:[%s4545_s0 + $0x80] sm:$0xff] }
   0x8   :  { %3181 = vmatprep.subr.mxu0 %v105_v4  ;;  %v58_v21 = vld [vmem:[%s4545_s0 + $0x88] sm:$0xff]  ;;  %v59_v22 = vld [vmem:[%s4545_s0 + $0x90] sm:$0xff]  ;;  %v60_v23 = vld [vmem:[%s4545_s0 + $0x98] sm:$0xff] }
   0x9   :  { %3182 = vmatpush3.msra.mxu0 %v105_v4  ;;  %v61_v24 = vld [vmem:[%s4545_s0 + $0xa0] sm:$0xff]  ;;  %v62_v25 = vld [vmem:[%s4545_s0 + $0xa8] sm:$0xff]  ;;  %v63_v26 = vld [vmem:[%s4545_s0 + $0xb0] sm:$0xff] }
   0xa   :  { %3184 = vmatmul.mubr.msk.f32.vlgmr.msra.gmra.mxu0 %vm116_vm0, %v42_v5  ;;  %v64_v27 = vld [vmem:[%s4545_s0 + $0xb8] sm:$0xff]  ;;  %v65_v28 = vld [vmem:[%s4545_s0 + $0xc0] sm:$0xff]  ;;  %v66_v29 = vld [vmem:[%s4545_s0 + $0xc8] sm:$0xff] }
   0xb   :  { %3186 = vmatprep.mubr.msk.f32.mxu0 %vm116_vm0, %v43_v6  ;;  %v67_v30 = vld [vmem:[%s4545_s0 + $0xd0] sm:$0xff]  ;;  %v68_v31 = vld [vmem:[%s4545_s0 + $0xd8] sm:$0xff]  ;;  %v69_v32 = vld [vmem:[%s4545_s0 + $0xe0] sm:$0xff] }
   0xc   :  { %v70_v33 = vld [vmem:[%s4545_s0 + $0xe8] sm:$0xff]  ;;  %v71_v34 = vld [vmem:[%s4545_s0 + $0xf0] sm:$0xff] }
   0xe   :  { %3187 = vmatmul.mubr.msk.f32.gmra.mxu0 %vm116_vm0, %v44_v7 }
   0xf   :  { %3189 = vmatprep.mubr.msk.f32.mxu0 %vm116_vm0, %v45_v8 }
  0x12   :  { %3190 = vmatmul.mubr.msk.f32.gmra.mxu0 %vm116_vm0, %v46_v9 }
  0x13   :  { %3192 = vmatprep.mubr.msk.f32.mxu0 %vm116_vm0, %v47_v10 }
  0x16   :  { %3193 = vmatmul.mubr.msk.f32.gmra.mxu0 %vm116_vm0, %v48_v11 }
  0x17   :  { %3195 = vmatprep.mubr.msk.f32.mxu0 %vm116_vm0, %v49_v12 }
  0x1a   :  { %3196 = vmatmul.mubr.msk.f32.gmra.mxu0 %vm116_vm0, %v50_v13 }
  0x1b   :  { %3198 = vmatprep.mubr.msk.f32.mxu0 %vm116_vm0, %v51_v14 }
  0x1e   :  { %3199 = vmatmul.mubr.msk.f32.gmra.mxu0 %vm116_vm0, %v52_v15 }
  0x1f   :  { %3201 = vmatprep.mubr.msk.f32.mxu0 %vm116_vm0, %v53_v16 }
  0x22   :  { %3202 = vmatmul.mubr.msk.f32.gmra.mxu0 %vm116_vm0, %v54_v17 }
  0x23   :  { %3204 = vmatprep.mubr.msk.f32.mxu0 %vm116_vm0, %v55_v18 }
  0x26   :  { %3205 = vmatmul.mubr.msk.f32.gmra.mxu0 %vm116_vm0, %v56_v19 }
  0x27   :  { %3207 = vmatprep.mubr.msk.f32.mxu0 %vm116_vm0, %v57_v20 }
  0x2a   :  { %3208 = vmatmul.mubr.msk.f32.gmra.mxu0 %vm116_vm0, %v58_v21 }
  0x2b   :  { %3210 = vmatprep.mubr.msk.f32.mxu0 %vm116_vm0, %v59_v22 }
  0x2e   :  { %3211 = vmatmul.mubr.msk.f32.gmra.mxu0 %vm116_vm0, %v60_v23 }
  0x2f   :  { %3213 = vmatprep.mubr.msk.f32.mxu0 %vm116_vm0, %v61_v24 }
  0x32   :  { %3214 = vmatmul.mubr.msk.f32.gmra.mxu0 %vm116_vm0, %v62_v25 }
  0x33   :  { %3216 = vmatprep.mubr.msk.f32.mxu0 %vm116_vm0, %v63_v26 }
  0x36   :  { %3217 = vmatmul.mubr.msk.f32.gmra.mxu0 %vm116_vm0, %v64_v27 }
  0x37   :  { %3219 = vmatprep.mubr.msk.f32.mxu0 %vm116_vm0, %v65_v28 }
  0x3a   :  { %3220 = vmatmul.mubr.msk.f32.gmra.mxu0 %vm116_vm0, %v66_v29 }
  0x3b   :  { %3222 = vmatprep.mubr.msk.f32.mxu0 %vm116_vm0, %v67_v30 }
  0x3e   :  { %3223 = vmatmul.mubr.msk.f32.gmra.mxu0 %vm116_vm0, %v68_v31 }
  0x3f   :  { %3225 = vmatprep.mubr.msk.f32.mxu0 %vm116_vm0, %v69_v32 }
  0x42   :  { %3226 = vmatmul.mubr.msk.f32.gmra.mxu0 %vm116_vm0, %v70_v33 }
  0x43   :  { %19 = vsyncpa [#allocation5], 0  ;;  %3228 = vmatprep.mubr.msk.f32.mxu0 %vm116_vm0, %v71_v34  ;;  %v72_v35 = vld [vmem:[%s4545_s0 + $0xf8] sm:$0xff]  ;;  %v73_v36 = vld [vmem:[%s4545_s0 + $0x100] sm:$0xff]  ;;  %v3446_v4 = vmov 1983009808   ;;  %v764_v6 = vlaneseq }
  0x44   :  { %v74_v37 = vld [vmem:[%s4545_s0 + $0x108] sm:$0xff]  ;;  %v75_v38 = vld [vmem:[%s4545_s0 + $0x110] sm:$0xff]  ;;  %v76_v39 = vld [vmem:[%s4545_s0 + $0x118] sm:$0xff]  ;;  %v762_v5 = vunpack.c.l.s4 %v3446_v4 }
  0x45   :  { %v77_v40 = vld [vmem:[%s4545_s0 + $0x120] sm:$0xff]  ;;  %v78_v41 = vld [vmem:[%s4545_s0 + $0x128] sm:$0xff]  ;;  %v79_v42 = vld [vmem:[%s4545_s0 + $0x130] sm:$0xff]  ;;  %v3785_v8 = vshrl.u32 %v764_v6, 7 }
  0x46   :  { %3229 = vmatmul.mubr.msk.f32.gmra.mxu0 %vm116_vm0, %v72_v35  ;;  %v80_v43 = vld [vmem:[%s4545_s0 + $0x138] sm:$0xff]  ;;  %v81_v44 = vld [vmem:[%s4545_s0 + $0x140] sm:$0xff]  ;;  %v82_v45 = vld [vmem:[%s4545_s0 + $0x148] sm:$0xff]  ;;  %v763_v7 = vunpack.c.0.s8 %v762_v5 }
  0x47   :  { %3231 = vmatprep.mubr.msk.f32.mxu0 %vm116_vm0, %v73_v36  ;;  %v83_v46 = vld [vmem:[%s4545_s0 + $0x150] sm:$0xff]  ;;  %v84_v47 = vld [vmem:[%s4545_s0 + $0x158] sm:$0xff]  ;;  %v85_v48 = vld [vmem:[%s4545_s0 + $0x160] sm:$0xff] }
  0x48   :  { %v86_v49 = vld [vmem:[%s4545_s0 + $0x168] sm:$0xff]  ;;  %v87_v50 = vld [vmem:[%s4545_s0 + $0x170] sm:$0xff]  ;;  %v88_v51 = vld [vmem:[%s4545_s0 + $0x178] sm:$0xff]  ;;  %v3788_v9 = vsub.s32 %v763_v7, %v3785_v8 }
  0x49   :  { %v89_v52 = vld [vmem:[%s4545_s0 + $0x180] sm:$0xff]  ;;  %v90_v53 = vld [vmem:[%s4545_s0 + $0x188] sm:$0xff]  ;;  %v91_v54 = vld [vmem:[%s4545_s0 + $0x190] sm:$0xff] }
  0x4a   :  { %3232 = vmatmul.mubr.msk.f32.gmra.mxu0 %vm116_vm0, %v74_v37  ;;  %v92_v55 = vld [vmem:[%s4545_s0 + $0x198] sm:$0xff]  ;;  %v93_v56 = vld [vmem:[%s4545_s0 + $0x1a0] sm:$0xff]  ;;  %v94_v57 = vld [vmem:[%s4545_s0 + $0x1a8] sm:$0xff] }
  0x4b   :  { %3234 = vmatprep.mubr.msk.f32.mxu0 %vm116_vm0, %v75_v38  ;;  %v95_v58 = vld [vmem:[%s4545_s0 + $0x1b0] sm:$0xff]  ;;  %v96_v59 = vld [vmem:[%s4545_s0 + $0x1b8] sm:$0xff]  ;;  %v97_v60 = vld [vmem:[%s4545_s0 + $0x1c0] sm:$0xff] }
  0x4c   :  { %v98_v61 = vld [vmem:[%s4545_s0 + $0x1c8] sm:$0xff]  ;;  %v99_v62 = vld [vmem:[%s4545_s0 + $0x1d0] sm:$0xff]  ;;  %v100_v63 = vld [vmem:[%s4545_s0 + $0x1d8] sm:$0xff] }
  0x4d   :  { %v101_v0 = vld [vmem:[%s4545_s0 + $0x1e0] sm:$0xff]  ;;  %v102_v1 = vld [vmem:[%s4545_s0 + $0x1e8] sm:$0xff]  ;;  %v103_v2 = vld [vmem:[%s4545_s0 + $0x1f0] sm:$0xff] }
  0x4e   :  { %3235 = vmatmul.mubr.msk.f32.gmra.mxu0 %vm116_vm0, %v76_v39  ;;  %v104_v3 = vld [vmem:[%s4545_s0 + $0x1f8] sm:$0xff]  ;;  %v3793_v10 = vld [vmem:[%s4546_s1] sm:$0xff] }
  0x4f   :  { %3237 = vmatprep.mubr.msk.f32.mxu0 %vm116_vm0, %v77_v40  ;;  %v3797_v11 = vrot.slane %v3793_v10, %v3788_v9 }
  0x51   :  { %v775_v12 = vcombine.high %v3797_v11, %v3797_v11 }
  0x52   :  { %3238 = vmatmul.mubr.msk.f32.gmra.mxu0 %vm116_vm0, %v78_v41 }
  0x53   :  { %3240 = vmatprep.mubr.msk.f32.mxu0 %vm116_vm0, %v79_v42  ;;  %845 = vmatprep.mubr.f32.mxu1 %v775_v12 }
  0x56   :  { %3241 = vmatmul.mubr.msk.f32.gmra.mxu0 %vm116_vm0, %v80_v43  ;;  %v3834_v43 = vld [vmem:[%s4548_s3] ss:$0 sm:$0xff] }
  0x57   :  { %3243 = vmatprep.mubr.msk.f32.mxu0 %vm116_vm0, %v81_v44 }
  0x5a   :  { %3244 = vmatmul.mubr.msk.f32.gmra.mxu0 %vm116_vm0, %v82_v45 }
  0x5b   :  { %3246 = vmatprep.mubr.msk.f32.mxu0 %vm116_vm0, %v83_v46 }
  0x5e   :  { %3247 = vmatmul.mubr.msk.f32.gmra.mxu0 %vm116_vm0, %v84_v47 }
  0x5f   :  { %3249 = vmatprep.mubr.msk.f32.mxu0 %vm116_vm0, %v85_v48 }
  0x62   :  { %3250 = vmatmul.mubr.msk.f32.gmra.mxu0 %vm116_vm0, %v86_v49 }
  0x63   :  { %3252 = vmatprep.mubr.msk.f32.mxu0 %vm116_vm0, %v87_v50 }
  0x66   :  { %3253 = vmatmul.mubr.msk.f32.gmra.mxu0 %vm116_vm0, %v88_v51 }
  0x67   :  { %3255 = vmatprep.mubr.msk.f32.mxu0 %vm116_vm0, %v89_v52 }
  0x6a   :  { %3256 = vmatmul.mubr.msk.f32.gmra.mxu0 %vm116_vm0, %v90_v53 }
  0x6b   :  { %3258 = vmatprep.mubr.msk.f32.mxu0 %vm116_vm0, %v91_v54 }
  0x6e   :  { %3259 = vmatmul.mubr.msk.f32.gmra.mxu0 %vm116_vm0, %v92_v55 }
  0x6f   :  { %3261 = vmatprep.mubr.msk.f32.mxu0 %vm116_vm0, %v93_v56 }
  0x72   :  { %3262 = vmatmul.mubr.msk.f32.gmra.mxu0 %vm116_vm0, %v94_v57 }
  0x73   :  { %3264 = vmatprep.mubr.msk.f32.mxu0 %vm116_vm0, %v95_v58 }
  0x76   :  { %3265 = vmatmul.mubr.msk.f32.gmra.mxu0 %vm116_vm0, %v96_v59 }
  0x77   :  { %3267 = vmatprep.mubr.msk.f32.mxu0 %vm116_vm0, %v97_v60 }
  0x7a   :  { %3268 = vmatmul.mubr.msk.f32.gmra.mxu0 %vm116_vm0, %v98_v61 }
  0x7b   :  { %3270 = vmatprep.mubr.msk.f32.mxu0 %vm116_vm0, %v99_v62 }
  0x7e   :  { %3271 = vmatmul.mubr.msk.f32.gmra.mxu0 %vm116_vm0, %v100_v63 }
  0x7f   :  { %3273 = vmatprep.mubr.msk.f32.mxu0 %vm116_vm0, %v101_v0 }
  0x82   :  { %3274 = vmatmul.mubr.msk.f32.gmra.mxu0 %vm116_vm0, %v102_v1 }
  0x83   :  { %3276 = vmatprep.mubr.msk.f32.mxu0 %vm116_vm0, %v103_v2 }
  0x86   :  { %3277 = vmatmul.mubr.msk.f32.gmra.mxu0 %vm116_vm0, %v104_v3 }
  0xca   :  { %v3801_v13 = vpop.f32.mrf.mxu0 }
  0xcc   :  { %v3803_v14 = vpop.f32.mrf.mxu0 }
  0xce   :  { %v3805_v15 = vpop.f32.mrf.mxu0 }
  0xd0   :  { %v3807_v16 = vpop.f32.mrf.mxu0 }
  0xd2   :  { %v3809_v17 = vpop.f32.mrf.mxu0 }
  0xd4   :  { %v3811_v18 = vpop.f32.mrf.mxu0 }
  0xd6   :  { %v3813_v19 = vpop.f32.mrf.mxu0 }
  0xd8   :  { %v3815_v20 = vpop.f32.mrf.mxu0 }
  0xda   :  { %v3197_v21 = vpop.f32.mrf.mxu0 }
  0xdb   :  { %v421_v12 = vadd.f32 %v3197_v21, %v3834_v43  ;;  %v411_v21 = vadd.f32 %v3813_v19, %v3834_v43  ;;  %v401_v19 = vadd.f32 %v3809_v17, %v3834_v43 }
  0xdc   :  { %v3817_v22 = vpop.f32.mrf.mxu0 }
  0xde   :  { %v3200_v23 = vpop.f32.mrf.mxu0 }
  0xdf   :  { %v431_v62 = vadd.f32 %v3200_v23, %v3834_v43 }
  0xe0   :  { %v425_v24 = vpop.f32.mrf.mxu0 }
  0xe1   :  { %v426_v3 = vadd.f32 %v3834_v43, %v425_v24  ;;  %v705_v23 = vmax.f32 %v431_v62, 0.0  ;;  %v416_v24 = vadd.f32 %v3834_v43, %v3817_v22  ;;  %v406_v22 = vadd.f32 %v3834_v43, %v3815_v20 }
  0xe2   :  { %v3203_v25 = vpop.f32.mrf.mxu0 }
  0xe3   :  { %v441_v52 = vadd.f32 %v3203_v25, %v3834_v43 }
  0xe4   :  { %v435_v26 = vpop.f32.mrf.mxu0 }
  0xe5   :  { %v436_v57 = vadd.f32 %v3834_v43, %v435_v26  ;;  %v707_v63 = vmax.f32 %v441_v52, 0.0 }
  0xe6   :  { %v3206_v27 = vpop.f32.mrf.mxu0 }
  0xe7   :  { %v451_v44 = vadd.f32 %v3206_v27, %v3834_v43  ;;  %v706_v4 = vmax.f32 %v436_v57, 0.0  ;;  %v386_v57 = vadd.f32 %v3834_v43, %v3807_v16 }
  0xe8   :  { %v445_v28 = vpop.f32.mrf.mxu0 }
  0xe9   :  { %v446_v47 = vadd.f32 %v3834_v43, %v445_v28  ;;  %v709_v53 = vmax.f32 %v451_v44, 0.0  ;;  %v704_v28 = vmax.f32 %v426_v3, 0.0 }
  0xea   :  { %v3819_v29 = vpop.f32.mrf.mxu0 }
  0xeb   :  { %v708_v58 = vmax.f32 %v446_v47, 0.0 }
  0xec   :  { %v3821_v30 = vpop.f32.mrf.mxu0 }
  0xed   :  { %v456_v16 = vadd.f32 %v3834_v43, %v3821_v30 }
  0xee   :  { %v3823_v31 = vpop.f32.mrf.mxu0 }
  0xf0   :  { %v3825_v32 = vpop.f32.mrf.mxu0 }
  0xf2   :  { %v3827_v33 = vpop.f32.mrf.mxu0 }
  0xf4   :  { %v3829_v34 = vpop.f32.mrf.mxu0 }
  0xf6   :  { %v3218_v35 = vpop.f32.mrf.mxu0 }
  0xf8   :  { %v485_v36 = vpop.f32.mrf.mxu0 }
  0xfa   :  { %v3221_v37 = vpop.f32.mrf.mxu0 }
  0xfb   :  { %v501_v6 = vadd.f32 %v3221_v37, %v3834_v43  ;;  %v491_v37 = vadd.f32 %v3218_v35, %v3834_v43  ;;  %v481_v35 = vadd.f32 %v3827_v33, %v3834_v43  ;;  %v471_v33 = vadd.f32 %v3823_v31, %v3834_v43 }
  0xfc   :  { %v495_v38 = vpop.f32.mrf.mxu0  ;;  %v760_v31 = vcombine.high %v3793_v10, %v3793_v10  ;;  %v696_v10 = vmax.f32 %v386_v57, 0.0 }
  0xfd   :  { %v496_v26 = vadd.f32 %v3834_v43, %v495_v38  ;;  %v486_v38 = vadd.f32 %v3834_v43, %v485_v36  ;;  %v717_v47 = vmax.f32 %v491_v37, 0.0  ;;  %v476_v36 = vadd.f32 %v3834_v43, %v3829_v34 }
  0xfe   :  { %v3224_v39 = vpop.f32.mrf.mxu0  ;;  %v715_v17 = vmax.f32 %v481_v35, 0.0  ;;  %v466_v34 = vadd.f32 %v3834_v43, %v3825_v32  ;;  %v381_v32 = vadd.f32 %v3801_v13, %v3834_v43 }
  0xff   :  { %v511_v60 = vadd.f32 %v3224_v39, %v3834_v43  ;;  %v718_v44 = vmax.f32 %v496_v26, 0.0  ;;  %v716_v20 = vmax.f32 %v486_v38, 0.0 }
 0x100   :  { %v505_v40 = vpop.f32.mrf.mxu0  ;;  %v695_v13 = vmax.f32 %v381_v32, 0.0 }
 0x101   :  { %v506_v1 = vadd.f32 %v3834_v43, %v505_v40  ;;  %v721_v7 = vmax.f32 %v511_v60, 0.0  ;;  %v719_v40 = vmax.f32 %v501_v6, 0.0 }
 0x102   :  { %v3227_v41 = vpop.f32.mrf.mxu0 }
 0x103   :  { %v521_v49 = vadd.f32 %v3227_v41, %v3834_v43  ;;  %v720_v27 = vmax.f32 %v506_v1, 0.0  ;;  %v703_v41 = vmax.f32 %v421_v12, 0.0  ;;  %v712_v1 = vmax.f32 %v466_v34, 0.0 }
 0x104   :  { %v515_v42 = vpop.f32.mrf.mxu0 }
 0x105   :  { %v516_v55 = vadd.f32 %v3834_v43, %v515_v42  ;;  %v723_v61 = vmax.f32 %v521_v49, 0.0 }
 0x106   :  { %v3230_v45 = vpop.f32.mrf.mxu0 }
 0x107   :  { %v531_v46 = vadd.f32 %v3230_v45, %v3834_v43  ;;  %v722_v2 = vmax.f32 %v516_v55, 0.0  ;;  %v702_v45 = vmax.f32 %v416_v24, 0.0  ;;  %v699_v55 = vmax.f32 %v401_v19, 0.0 }
 0x108   :  { %v525_v48 = vpop.f32.mrf.mxu0 }
 0x109   :  { %v526_v50 = vadd.f32 %v3834_v43, %v525_v48  ;;  %v725_v51 = vmax.f32 %v531_v46, 0.0  ;;  %v701_v48 = vmax.f32 %v411_v21, 0.0 }
 0x10a   :  { %v3842_v54 = vpop.f32.mrf.mxu0 }
 0x10b   :  { %v724_v56 = vmax.f32 %v526_v50, 0.0  ;;  %3017 = vmatprep.subr.mxu1 %v725_v51  ;;  %v396_v50 = vadd.f32 %v3834_v43, %v3811_v18  ;;  %v700_v51 = vmax.f32 %v406_v22, 0.0  ;;  %v714_v18 = vmax.f32 %v476_v36, 0.0 }
 0x10c   :  { %v3846_v59 = vpop.f32.mrf.mxu0  ;;  %3018 = vmatpush3.msra.mxu1 %v709_v53  ;;  %v391_v53 = vadd.f32 %v3805_v15, %v3834_v43  ;;  %v461_v15 = vadd.f32 %v3819_v29, %v3834_v43  ;;  %v3910_v29 = vrot.slane %v760_v31, %v3788_v9 }
 0x10d   :  { %3019 = vmatprep.subr.mxu1 %v724_v56 }
 0x10e   :  { %v3850_v0 = vpop.f32.mrf.mxu0  ;;  %3020 = vmatpush3.msra.mxu1 %v708_v58  ;;  %v698_v58 = vmax.f32 %v396_v50, 0.0  ;;  %v697_v62 = vmax.f32 %v391_v53, 0.0 }
 0x10f   :  { %3021 = vmatprep.subr.mxu1 %v723_v61  ;;  %v713_v61 = vmax.f32 %v471_v33, 0.0 }
 0x110   :  { %v3854_v5 = vpop.f32.mrf.mxu0  ;;  %3022 = vmatpush3.msra.mxu1 %v707_v63 }
 0x111   :  { %3023 = vmatprep.subr.mxu1 %v722_v2  ;;  %v376_v2 = vadd.f32 %v3834_v43, %v3803_v14 }
 0x112   :  { %v3858_v25 = vpop.f32.mrf.mxu0  ;;  %3024 = vmatpush3.msra.mxu1 %v706_v4  ;;  %v711_v4 = vmax.f32 %v461_v15, 0.0 }
 0x113   :  { %3025 = vmatprep.subr.mxu1 %v721_v7  ;;  %v710_v7 = vmax.f32 %v456_v16, 0.0  ;;  %v694_v12 = vmax.f32 %v376_v2, 0.0 }
 0x114   :  { %v3863_v39 = vpop.f32.mrf.mxu0  ;;  %3026 = vmatpush3.msra.mxu1 %v705_v23  ;;  %v776_v23 = vcombine.high %v3910_v29, %v3910_v29 }
 0x115   :  { %3027 = vmatprep.subr.mxu1 %v720_v27 }
 0x116   :  { %v3868_v42 = vpop.f32.mrf.mxu0  ;;  %3028 = vmatpush3.msra.mxu1 %v704_v28 }
 0x117   :  { %3029 = vmatprep.subr.mxu1 %v719_v40 }
 0x118   :  { %v3873_v46 = vpop.f32.mrf.mxu0  ;;  %3030 = vmatpush3.msra.mxu1 %v703_v41 }
 0x119   :  { %3031 = vmatprep.subr.mxu1 %v718_v44 }
 0x11a   :  { %v3879_v49 = vpop.f32.mrf.mxu0  ;;  %3032 = vmatpush3.msra.mxu1 %v702_v45 }
 0x11b   :  { %3033 = vmatprep.subr.mxu1 %v717_v47  ;;  %v581_v2 = vadd.f32 %v3879_v49, %v3834_v43 }
 0x11c   :  { %v3885_v52 = vpop.f32.mrf.mxu0  ;;  %3034 = vmatpush3.msra.mxu1 %v701_v48 }
 0x11d   :  { %3035 = vmatprep.subr.mxu1 %v716_v20 }
 0x11e   :  { %v3891_v56 = vpop.f32.mrf.mxu0  ;;  %3036 = vmatpush3.msra.mxu1 %v700_v51 }
 0x11f   :  { %3037 = vmatprep.subr.mxu1 %v715_v17  ;;  %v591_v31 = vadd.f32 %v3891_v56, %v3834_v43 }
 0x120   :  { %v3897_v60 = vpop.f32.mrf.mxu0  ;;  %3038 = vmatpush3.msra.mxu1 %v699_v55 }
 0x121   :  { %3039 = vmatprep.subr.mxu1 %v714_v18 }
 0x122   :  { %v3251_v63 = vpop.f32.mrf.mxu0  ;;  %3040 = vmatpush3.msra.mxu1 %v698_v58 }
 0x123   :  { %3041 = vmatprep.subr.mxu1 %v713_v61  ;;  %v601_v33 = vadd.f32 %v3251_v63, %v3834_v43 }
 0x124   :  { %v595_v3 = vpop.f32.mrf.mxu0  ;;  %3042 = vmatpush3.msra.mxu1 %v697_v62  ;;  %v586_v62 = vadd.f32 %v3834_v43, %v3897_v60 }
 0x125   :  { %3043 = vmatprep.subr.mxu1 %v712_v1  ;;  %v596_v34 = vadd.f32 %v3834_v43, %v595_v3  ;;  %v739_v15 = vmax.f32 %v601_v33, 0.0 }
 0x126   :  { %v3254_v6 = vpop.f32.mrf.mxu0  ;;  %3044 = vmatpush3.msra.mxu1 %v696_v10  ;;  %v737_v10 = vmax.f32 %v591_v31, 0.0  ;;  %v3288_v31 = vld [vmem:[%s4551_s6 + $0xf0] sm:$0xff]  }
 0x127   :  { %3045 = vmatprep.subr.mxu1 %v711_v4  ;;  %v738_v63 = vmax.f32 %v596_v34, 0.0  ;;  %v576_v4 = vadd.f32 %v3834_v43, %v3885_v52  ;;  %v948_v34 = vld [vmem:[%s4549_s4 + $0xd8] sm:$0xff] }
 0x128   :  { %v605_v30 = vpop.f32.mrf.mxu0  ;;  %3046 = vmatpush3.msra.mxu1 %v695_v13  ;;  %v736_v13 = vmax.f32 %v586_v62, 0.0  ;;  %v3292_v62 = vld [vmem:[%s4551_s6 + $0xe0] sm:$0xff]  }
 0x129   :  { %3047 = vmatprep.subr.mxu1 %v710_v7  ;;  %v606_v48 = vadd.f32 %v3834_v43, %v605_v30  ;;  %v571_v7 = vadd.f32 %v3868_v42, %v3834_v43 }
 0x12a   :  { %v3914_v14 = vpop.f32.mrf.mxu0  ;;  %3048 = vmatpush3.msra.mxu1 %v694_v12  ;;  %v735_v12 = vmax.f32 %v581_v2, 0.0  ;;  %v3296_v2 = vld [vmem:[%s4551_s6 + $0xd0] sm:$0xff]  }
 0x12b   :  { %846 = vmatmul.mubr.f32.vlgmr.msra.gmra.mxu1 %v3797_v11  ;;  %v611_v11 = vadd.f32 %v3254_v6, %v3834_v43  ;;  %v740_v18 = vmax.f32 %v606_v48, 0.0 }
 0x12c   :  { %v3917_v26 = vpop.f32.mrf.mxu0  ;;  %915 = vmatprep.mubr.f32.mxu1 %v776_v23  ;;  %v566_v23 = vadd.f32 %v3834_v43, %v3873_v46 }
 0x12d   :  { %v741_v17 = vmax.f32 %v611_v11, 0.0 }
 0x12e   :  { %v3919_v27 = vpop.f32.mrf.mxu0  ;;  %v732_v46 = vmax.f32 %v566_v23, 0.0 }
 0x130   :  { %v3921_v24 = vpop.f32.mrf.mxu0 }
 0x132   :  { %v3263_v28 = vpop.f32.mrf.mxu0 }
 0x133   :  { %v641_v52 = vadd.f32 %v3263_v28, %v3834_v43  ;;  %v631_v28 = vadd.f32 %v3919_v27, %v3834_v43  ;;  %v621_v27 = vadd.f32 %v3914_v14, %v3834_v43 }
 0x134   :  { %v3923_v37 = vpop.f32.mrf.mxu0 }
 0x135   :  { %v636_v42 = vadd.f32 %v3834_v43, %v3923_v37  ;;  %v626_v37 = vadd.f32 %v3834_v43, %v3921_v24  ;;  %v616_v24 = vadd.f32 %v3834_v43, %v3917_v26  ;;  %v937_v26 = vld [vmem:[%s4549_s4 + $0x80] sm:$0xff] }
 0x136   :  { %v3266_v40 = vpop.f32.mrf.mxu0 }
 0x137   :  { %v651_v60 = vadd.f32 %v3266_v40, %v3834_v43  ;;  %v561_v40 = vadd.f32 %v3858_v25, %v3834_v43  ;;  %v551_v25 = vadd.f32 %v3850_v0, %v3834_v43  ;;  %v746_v11 = vmax.f32 %v636_v42, 0.0  ;;  %v924_v42 = vld [vmem:[%s4549_s4 + $0x18] sm:$0xff] }
 0x138   :  { %v645_v21 = vpop.f32.mrf.mxu0  ;;  %v541_v0 = vadd.f32 %v3842_v54, %v3834_v43  ;;  %v946_v54 = vld [vmem:[%s4549_s4 + $0xc8] sm:$0xff] }
 0x139   :  { %v646_v49 = vadd.f32 %v3834_v43, %v645_v21  ;;  %v729_v48 = vmax.f32 %v551_v25, 0.0  ;;  %v934_v25 = vld [vmem:[%s4549_s4 + $0x68] sm:$0xff] }
 0x13a   :  { %v3269_v41 = vpop.f32.mrf.mxu0  ;;  %v727_v14 = vmax.f32 %v541_v0, 0.0  ;;  %v936_v0 = vld [vmem:[%s4549_s4 + $0x78] sm:$0xff] }
 0x13b   :  { %v661_v16 = vadd.f32 %v3269_v41, %v3834_v43  ;;  %v734_v41 = vmax.f32 %v576_v4, 0.0  ;;  %v748_v21 = vmax.f32 %v646_v49, 0.0  ;;  %v3312_v4 = vld [vmem:[%s4551_s6 + $0xc0] sm:$0xff]  }
 0x13c   :  { %v655_v38 = vpop.f32.mrf.mxu0 }
 0x13d   :  { %v656_v56 = vadd.f32 %v3834_v43, %v655_v38  ;;  %v751_v6 = vmax.f32 %v661_v16, 0.0  ;;  %v749_v38 = vmax.f32 %v651_v60, 0.0  ;;  %v3294_v16 = vld [vmem:[%s4551_s6 + $0xd8] sm:$0xff]  }
 0x13e   :  { %v3272_v44 = vpop.f32.mrf.mxu0 }
 0x13f   :  { %v671_v57 = vadd.f32 %v3272_v44, %v3834_v43  ;;  %v750_v30 = vmax.f32 %v656_v56, 0.0  ;;  %v733_v44 = vmax.f32 %v571_v7, 0.0  ;;  %v3302_v56 = vld [vmem:[%s4551_s6 + $0xc8] sm:$0xff]  }
 0x140   :  { %v665_v22 = vpop.f32.mrf.mxu0 }
 0x141   :  { %v666_v61 = vadd.f32 %v3834_v43, %v665_v22  ;;  %v753_v1 = vmax.f32 %v671_v57, 0.0  ;;  %v556_v22 = vadd.f32 %v3834_v43, %v3863_v39  ;;  %v546_v39 = vadd.f32 %v3834_v43, %v3854_v5  ;;  %v3286_v57 = vld [vmem:[%s4551_s6 + $0xf8] sm:$0xff]  }
 0x142   :  { %v3275_v45 = vpop.f32.mrf.mxu0  ;;  %v536_v5 = vadd.f32 %v3834_v43, %v3846_v59  ;;  %v938_v59 = vld [vmem:[%s4549_s4 + $0x88] sm:$0xff]  ;;  %3109 = vmatprep.subr.bf16.mxu0 %v3286_v57  ;;  %v3318_v57 = vld [vmem:[%s4551_s6 + $0x178] sm:$0xff]  }
 0x143   :  { %v681_v20 = vadd.f32 %v3275_v45, %v3834_v43  ;;  %v752_v3 = vmax.f32 %v666_v61, 0.0  ;;  %v747_v45 = vmax.f32 %v641_v52, 0.0  ;;  %v3290_v61 = vld [vmem:[%s4551_s6 + $0xe8] sm:$0xff]   ;;  %v940_v52 = vld [vmem:[%s4549_s4 + $0x98] sm:$0xff] }
 0x144   :  { %v675_v35 = vpop.f32.mrf.mxu0  ;;  %v726_v33 = vmax.f32 %v536_v5, 0.0  ;;  %v3298_v5 = vld [vmem:[%s4551_s6 + $0x78] sm:$0xff]  }
 0x145   :  { %v676_v53 = vadd.f32 %v3834_v43, %v675_v35  ;;  %v755_v58 = vmax.f32 %v681_v20, 0.0  ;;  %v731_v35 = vmax.f32 %v561_v40, 0.0  ;;  %v728_v20 = vmax.f32 %v546_v39, 0.0  ;;  %v932_v40 = vld [vmem:[%s4549_s4 + $0x58] sm:$0xff] }
 0x146   :  { %v3278_v47 = vpop.f32.mrf.mxu0  ;;  %v952_v39 = vld [vmem:[%s4549_s4 + $0xf8] sm:$0xff] }
 0x147   :  { %v691_v19 = vadd.f32 %v3278_v47, %v3834_v43  ;;  %v754_v32 = vmax.f32 %v676_v53, 0.0  ;;  %v730_v47 = vmax.f32 %v556_v22, 0.0  ;;  %v922_v53 = vld [vmem:[%s4549_s4 + $0x8] sm:$0xff] }
 0x148   :  { %v685_v36 = vpop.f32.mrf.mxu0  ;;  %v950_v22 = vld [vmem:[%s4549_s4 + $0xe8] sm:$0xff] }
 0x149   :  { %v757_v50 = vmax.f32 %v691_v19, 0.0  ;;  %v686_v51 = vadd.f32 %v3834_v43, %v685_v36  ;;  %v745_v19 = vmax.f32 %v631_v28, 0.0  ;;  %v744_v36 = vmax.f32 %v626_v37, 0.0  ;;  %v945_v43 = vld [vmem:[%s4549_s4 + $0xc0] sm:$0xff]  ;;  %v942_v28 = vld [vmem:[%s4549_s4 + $0xa8] sm:$0xff] }
 0x14a   :  { %v926_v37 = vld [vmem:[%s4549_s4 + $0x28] sm:$0xff] }
 0x14b   :  { %v756_v55 = vmax.f32 %v686_v51, 0.0  ;;  %3052 = vmatprep.subr.mxu1 %v757_v50  ;;  %v743_v50 = vmax.f32 %v621_v27, 0.0  ;;  %v742_v51 = vmax.f32 %v616_v24, 0.0  ;;  %v944_v27 = vld [vmem:[%s4549_s4 + $0xb8] sm:$0xff] }
 0x14c   :  { %3053 = vmatpush3.msra.mxu1 %v741_v17  ;;  %v929_v17 = vld [vmem:[%s4549_s4 + $0x40] sm:$0xff]  ;;  %v928_v24 = vld [vmem:[%s4549_s4 + $0x38] sm:$0xff] }
 0x14d   :  { %3054 = vmatprep.subr.mxu1 %v756_v55  ;;  %v921_v55 = vld [vmem:[%s4549_s4] sm:$0xff] }
 0x14e   :  { %3055 = vmatpush3.msra.mxu1 %v740_v18  ;;  %v3447_v18 = vmov 0.0  }
 0x14f   :  { %3056 = vmatprep.subr.mxu1 %v755_v58  ;;  %v3287_v58 = vld [vmem:[%s4551_s6 + $0xb8] sm:$0xff]  }
 0x150   :  { %3057 = vmatpush3.msra.mxu1 %v739_v15  ;;  %3110 = vmatpush3.bf16.msra.mxu0 %v3287_v58  ;;  %v3289_v15 = vld [vmem:[%s4551_s6 + $0xb0] sm:$0xff]   ;;  %v3322_v58 = vld [vmem:[%s4551_s6 + $0x1f8] sm:$0xff]  }
 0x151   :  { %3058 = vmatprep.subr.mxu1 %v754_v32  ;;  %3111 = vmatprep.subr.bf16.mxu0 %v3288_v31  ;;  %v3291_v32 = vld [vmem:[%s4551_s6 + $0xa8] sm:$0xff]   ;;  %v957_v31 = vsub.s32 0, %v3785_v8 }
 0x152   :  { %3059 = vmatpush3.msra.mxu1 %v738_v63  ;;  %v3293_v63 = vld [vmem:[%s4551_s6 + $0xa0] sm:$0xff]  }
 0x153   :  { %3060 = vmatprep.subr.mxu1 %v753_v1  ;;  %v3295_v1 = vld [vmem:[%s4551_s6 + $0x98] sm:$0xff]  }
 0x154   :  { %3061 = vmatpush3.msra.mxu1 %v737_v10  ;;  %3112 = vmatpush3.bf16.msra.mxu0 %v3289_v15  ;;  %v3297_v10 = vld [vmem:[%s4551_s6 + $0x90] sm:$0xff]   ;;  %v4185_v15 = vld [vmem:[%s4550_s5] sm:$0xff] }
 0x155   :  { %3062 = vmatprep.subr.mxu1 %v752_v3  ;;  %3113 = vmatprep.subr.bf16.mxu0 %v3290_v61  ;;  %v3304_v3 = vld [vmem:[%s4551_s6 + $0x88] sm:$0xff]   ;;  %v961_v61 = vsub.s32 1, %v3785_v8 }
 0x156   :  { %3063 = vmatpush3.msra.mxu1 %v736_v13  ;;  %v3314_v13 = vld [vmem:[%s4551_s6 + $0x80] sm:$0xff]  }
 0x157   :  { %3064 = vmatprep.subr.mxu1 %v751_v6 }
 0x158   :  { %3065 = vmatpush3.msra.mxu1 %v735_v12  ;;  %3114 = vmatpush3.bf16.msra.mxu0 %v3291_v32  ;;  %v958_v32 = vrot.slane %v4185_v15, %v957_v31 }
 0x159   :  { %3066 = vmatprep.subr.mxu1 %v750_v30  ;;  %3115 = vmatprep.subr.bf16.mxu0 %v3292_v62  ;;  %v962_v62 = vrot.slane %v4185_v15, %v961_v61 }
 0x15a   :  { %3067 = vmatpush3.msra.mxu1 %v734_v41  ;;  %v947_v41 = vld [vmem:[%s4549_s4 + $0xd0] sm:$0xff] }
 0x15b   :  { %3068 = vmatprep.subr.mxu1 %v749_v38  ;;  %v939_v38 = vld [vmem:[%s4549_s4 + $0x90] sm:$0xff] }
 0x15c   :  { %3069 = vmatpush3.msra.mxu1 %v733_v44  ;;  %3116 = vmatpush3.bf16.msra.mxu0 %v3293_v63  ;;  %v931_v44 = vld [vmem:[%s4549_s4 + $0x50] sm:$0xff] }
 0x15d   :  { %3070 = vmatprep.subr.mxu1 %v748_v21  ;;  %3117 = vmatprep.subr.bf16.mxu0 %v3294_v16  ;;  %v923_v21 = vld [vmem:[%s4549_s4 + $0x10] sm:$0xff] }
 0x15e   :  { %3071 = vmatpush3.msra.mxu1 %v732_v46  ;;  %v949_v46 = vld [vmem:[%s4549_s4 + $0xe0] sm:$0xff] }
 0x15f   :  { %3072 = vmatprep.subr.mxu1 %v747_v45  ;;  %v941_v45 = vld [vmem:[%s4549_s4 + $0xa0] sm:$0xff] }
 0x160   :  { %3073 = vmatpush3.msra.mxu1 %v731_v35  ;;  %3118 = vmatpush3.bf16.msra.mxu0 %v3295_v1  ;;  %v933_v35 = vld [vmem:[%s4549_s4 + $0x60] sm:$0xff] }
 0x161   :  { %3074 = vmatprep.subr.mxu1 %v746_v11  ;;  %3119 = vmatprep.subr.bf16.mxu0 %v3296_v2  ;;  %v925_v11 = vld [vmem:[%s4549_s4 + $0x20] sm:$0xff]  ;;  %v965_v2 = vsub.s32 2, %v3785_v8 }
 0x162   :  { %3075 = vmatpush3.msra.mxu1 %v730_v47  ;;  %v951_v47 = vld [vmem:[%s4549_s4 + $0xf0] sm:$0xff] }
 0x163   :  { %3076 = vmatprep.subr.mxu1 %v745_v19  ;;  %v943_v19 = vld [vmem:[%s4549_s4 + $0xb0] sm:$0xff] }
 0x164   :  { %3077 = vmatpush3.msra.mxu1 %v729_v48  ;;  %3120 = vmatpush3.bf16.msra.mxu0 %v3297_v10  ;;  %v935_v48 = vld [vmem:[%s4549_s4 + $0x70] sm:$0xff] }
 0x165   :  { %3078 = vmatprep.subr.mxu1 %v744_v36  ;;  %3121 = vmatprep.subr.bf16.mxu0 %v3302_v56  ;;  %v927_v36 = vld [vmem:[%s4549_s4 + $0x30] sm:$0xff]  ;;  %v969_v56 = vsub.s32 3, %v3785_v8 }
 0x166   :  { %3079 = vmatpush3.msra.mxu1 %v728_v20  ;;  %v3299_v20 = vld [vmem:[%s4551_s6 + $0x38] sm:$0xff]  }
 0x167   :  { %3080 = vmatprep.subr.mxu1 %v743_v50  ;;  %v3300_v50 = vld [vmem:[%s4551_s6 + $0x70] sm:$0xff]  }
 0x168   :  { %3081 = vmatpush3.msra.mxu1 %v727_v14  ;;  %3122 = vmatpush3.bf16.msra.mxu0 %v3304_v3  ;;  %v3301_v14 = vld [vmem:[%s4551_s6 + $0x30] sm:$0xff]  }
 0x169   :  { %3082 = vmatprep.subr.mxu1 %v742_v51  ;;  %3123 = vmatprep.subr.bf16.mxu0 %v3312_v4  ;;  %v3303_v51 = vld [vmem:[%s4551_s6 + $0x68] sm:$0xff]   ;;  %v3319_v4 = vld [vmem:[%s4551_s6 + $0x138] sm:$0xff]  }
 0x16a   :  { %3083 = vmatpush3.msra.mxu1 %v726_v33  ;;  %v3305_v33 = vld [vmem:[%s4551_s6 + $0x28] sm:$0xff]  }
 0x16b   :  { %916 = vmatmul.mubr.f32.vlgmr.msra.gmra.mxu1 %v3910_v29  ;;  %1022 = vmatprep.subr.mxu1 %v946_v54  ;;  %v930_v29 = vld [vmem:[%s4549_s4 + $0x48] sm:$0xff]  ;;  %v3306_v54 = vld [vmem:[%s4551_s6 + $0x60] sm:$0xff]   ;;  %s3450_s4 = smov [#allocation2]  }
 0x16c   :  { %1023 = vmatpush1.msra.mxu1 %v945_v43  ;;  %1062 = vmatprep.mubr.f32.mxu1 %v3447_v18  ;;  %v3307_v43 = vld [vmem:[%s4551_s6 + $0x20] sm:$0xff]   ;;  %s2708_s20 = sshll.u32 %s3450_s4, 4  ;;  %s2709_s20 = int_to_ptr.vmem [resolvable:$true] %s2708_s20 }
 0x16d   :  { %1024 = vmatprep.subr.mxu1 %v938_v59  ;;  %3124 = vmatpush3.bf16.msra.mxu0 %v3314_v13  ;;  %v3308_v59 = vld [vmem:[%s4551_s6 + $0x58] sm:$0xff]  }
 0x16e   :  { %1025 = vmatpush1.msra.mxu1 %v937_v26  ;;  %v3309_v26 = vld [vmem:[%s4551_s6 + $0x18] sm:$0xff]   ;;  %3153 = vmatprep.subr.bf16.mxu0 %v3322_v58 }
 0x16f   :  { %1026 = vmatprep.subr.mxu1 %v930_v29  ;;  %v3310_v29 = vld [vmem:[%s4551_s6 + $0x50] sm:$0xff]  }
 0x170   :  { %1027 = vmatpush1.msra.mxu1 %v929_v17  ;;  %v3311_v17 = vld [vmem:[%s4551_s6 + $0x10] sm:$0xff]  }
 0x171   :  { %1028 = vmatprep.subr.mxu1 %v922_v53  ;;  %v3313_v53 = vld [vmem:[%s4551_s6 + $0x48] sm:$0xff]  }
 0x172   :  { %1029 = vmatpush1.msra.mxu1 %v921_v55  ;;  %v3315_v55 = vld [vmem:[%s4551_s6 + $0x8] sm:$0xff]  }
 0x173   :  { %1093 = vmatprep.subr.mxu1 %v948_v34  ;;  %v3316_v34 = vld [vmem:[%s4551_s6 + $0x40] sm:$0xff]  }
 0x1eb   :  { %v3049_v60 = vpop.f32.mrf.mxu1 }
 0x1ed   :  { %v3050_v6 = vpop.f32.mrf.mxu1 }
 0x1ee   :  { %v3051_v49 = vadd.f32 %v3050_v6, %v3049_v60  ;;  %v966_v60 = vrot.slane %v4185_v15, %v965_v2  ;;  %v3320_v6 = vld [vmem:[%s4551_s6 + $0x170] sm:$0xff]  }
 0x22b   :  { %v3084_v7 = vpop.f32.mrf.mxu1 }
 0x22d   :  { %v3085_v12 = vpop.f32.mrf.mxu1 }
 0x22e   :  { %v3086_v30 = vadd.f32 %v3085_v12, %v3084_v7  ;;  %v970_v7 = vrot.slane %v4185_v15, %v969_v56 }
 0x230   :  { %v918_v23 = vadd.f32 %v3086_v30, %v3051_v49  ;;  %v3321_v49 = vld [vmem:[%s4551_s6 + $0x130] sm:$0xff]  }
 0x232   :  { %2808 = vmatmul.mubr.msk.f32.vlgmr.msra.gmra.mxu1 %vm116_vm0, %v918_v23 }
 0x233   :  { %1094 = vmatpush1.msra.mxu1 %v947_v41  ;;  %1133 = vmatprep.mubr.f32.mxu1 %v3447_v18  ;;  %v3323_v41 = vld [vmem:[%s4551_s6 + $0x168] sm:$0xff]  }
 0x234   :  { %1095 = vmatprep.subr.mxu1 %v940_v52 }
 0x235   :  { %1096 = vmatpush1.msra.mxu1 %v939_v38 }
 0x236   :  { %1097 = vmatprep.subr.mxu1 %v932_v40  ;;  %v977_v40 = vsub.s32 5, %v3785_v8 }
 0x237   :  { %1098 = vmatpush1.msra.mxu1 %v931_v44 }
 0x238   :  { %1099 = vmatprep.subr.mxu1 %v924_v42 }
 0x239   :  { %1100 = vmatpush1.msra.mxu1 %v923_v21  ;;  %v3324_v21 = vld [vmem:[%s4551_s6 + $0x1b8] sm:$0xff]  }
 0x23a   :  { %2809 = vmatmul.mubr.msk.f32.vlgmr.msra.gmra.mxu1 %vm116_vm0, %v918_v23  ;;  %1164 = vmatprep.subr.mxu1 %v950_v22  ;;  %v3325_v22 = vld [vmem:[%s4551_s6 + $0x128] sm:$0xff]  }
 0x23b   :  { %1165 = vmatpush1.msra.mxu1 %v949_v46  ;;  %1204 = vmatprep.mubr.f32.mxu1 %v3447_v18 }
 0x23c   :  { %1166 = vmatprep.subr.mxu1 %v942_v28  ;;  %v3326_v28 = vld [vmem:[%s4551_s6 + $0x1f0] sm:$0xff]  }
 0x23d   :  { %1167 = vmatpush1.msra.mxu1 %v941_v45  ;;  %v3327_v45 = vld [vmem:[%s4551_s6 + $0x160] sm:$0xff]  }
 0x23e   :  { %1168 = vmatprep.subr.mxu1 %v934_v25  ;;  %v978_v25 = vrot.slane %v4185_v15, %v977_v40 }
 0x23f   :  { %1169 = vmatpush1.msra.mxu1 %v933_v35 }
 0x240   :  { %1170 = vmatprep.subr.mxu1 %v926_v37 }
 0x241   :  { %1171 = vmatpush1.msra.mxu1 %v925_v11 }
 0x242   :  { %2810 = vmatmul.mubr.msk.f32.vlgmr.msra.gmra.mxu1 %vm116_vm0, %v918_v23  ;;  %1235 = vmatprep.subr.mxu1 %v952_v39  ;;  %v973_v39 = vsub.s32 4, %v3785_v8 }
 0x243   :  { %1236 = vmatpush1.msra.mxu1 %v951_v47  ;;  %1275 = vmatprep.mubr.f32.mxu1 %v3447_v18  ;;  %v3317_v18 = vld [vmem:[%s4551_s6] sm:$0xff]   ;;  %v3328_v47 = vld [vmem:[%s4551_s6 + $0x1b0] sm:$0xff]  }
 0x244   :  { %1237 = vmatprep.subr.mxu1 %v944_v27  ;;  %v3329_v27 = vld [vmem:[%s4551_s6 + $0x120] sm:$0xff]  }
 0x245   :  { %1238 = vmatpush1.msra.mxu1 %v943_v19 }
 0x246   :  { %1239 = vmatprep.subr.mxu1 %v936_v0 }
 0x247   :  { %1240 = vmatpush1.msra.mxu1 %v935_v48  ;;  %v3330_v48 = vld [vmem:[%s4551_s6 + $0x1e8] sm:$0xff]  }
 0x248   :  { %1241 = vmatprep.subr.mxu1 %v928_v24  ;;  %v3331_v24 = vld [vmem:[%s4551_s6 + $0x158] sm:$0xff]  }
 0x249   :  { %1242 = vmatpush1.msra.mxu1 %v927_v36 }
 0x24a   :  { %2811 = vmatmul.mubr.msk.f32.vlgmr.msra.gmra.mxu1 %vm116_vm0, %v918_v23  ;;  %3087 = vmatprep.subr.bf16.mxu1 %v3298_v5  ;;  %v981_v5 = vsub.s32 6, %v3785_v8 }
 0x24b   :  { %3088 = vmatpush3.bf16.msra.mxu1 %v3299_v20  ;;  %v985_v20 = vsub.s32 7, %v3785_v8 }
 0x24c   :  { %3089 = vmatprep.subr.bf16.mxu1 %v3300_v50  ;;  %v974_v50 = vrot.slane %v4185_v15, %v973_v39 }
 0x24f   :  { %3090 = vmatpush3.bf16.msra.mxu1 %v3301_v14 }
 0x250   :  { %3091 = vmatprep.subr.bf16.mxu1 %v3303_v51  ;;  %v3332_v51 = vld [vmem:[%s4551_s6 + $0x1a8] sm:$0xff]  }
 0x253   :  { %3092 = vmatpush3.bf16.msra.mxu1 %v3305_v33  ;;  %v3333_v33 = vld [vmem:[%s4551_s6 + $0x118] sm:$0xff]  }
 0x254   :  { %3093 = vmatprep.subr.bf16.mxu1 %v3306_v54  ;;  %v3334_v54 = vld [vmem:[%s4551_s6 + $0x1e0] sm:$0xff]  }
 0x257   :  { %3094 = vmatpush3.bf16.msra.mxu1 %v3307_v43  ;;  %v3335_v43 = vld [vmem:[%s4551_s6 + $0x150] sm:$0xff]  }
 0x258   :  { %3095 = vmatprep.subr.bf16.mxu1 %v3308_v59  ;;  %v982_v59 = vrot.slane %v4185_v15, %v981_v5 }
 0x25b   :  { %3096 = vmatpush3.bf16.msra.mxu1 %v3309_v26  ;;  %v986_v26 = vrot.slane %v4185_v15, %v985_v20 }
 0x25c   :  { %3097 = vmatprep.subr.bf16.mxu1 %v3310_v29 }
 0x25f   :  { %3098 = vmatpush3.bf16.msra.mxu1 %v3311_v17 }
 0x260   :  { %3099 = vmatprep.subr.bf16.mxu1 %v3313_v53  ;;  %v3336_v53 = vld [vmem:[%s4551_s6 + $0x1a0] sm:$0xff]  }
 0x263   :  { %3100 = vmatpush3.bf16.msra.mxu1 %v3315_v55  ;;  %v3337_v55 = vld [vmem:[%s4551_s6 + $0x110] sm:$0xff]  }
 0x264   :  { %3101 = vmatprep.subr.bf16.mxu1 %v3316_v34 }
 0x267   :  { %3102 = vmatpush3.bf16.msra.mxu1 %v3317_v18  ;;  %v3338_v18 = vld [vmem:[%s4551_s6 + $0x1d8] sm:$0xff]  }
 0x268   :  { %3131 = vmatprep.subr.bf16.mxu1 %v3318_v57  ;;  %v3339_v57 = vld [vmem:[%s4551_s6 + $0x148] sm:$0xff]  }
 0x2f2   :  { %v1064_v63 = vpop.f32.mrf.mxu1 }
 0x2f3   :  { %v1065_v16 = vadd.f32 %v1064_v63, %v958_v32 }
 0x2f4   :  { %v1066_v1 = vpop.f32.mrf.mxu1 }
 0x2f5   :  { %v1067_v10 = vadd.f32 %v1066_v1, %v962_v62  ;;  %v1328_v13 = vpack.c.bf16 %v1065_v16, %v1065_v16  ;;  %v3341_v1 = vld [vmem:[%s4551_s6 + $0x108] sm:$0xff]  }
 0x2f7   :  { %v1329_v3 = vpack.c.bf16 %v1067_v10, %v1067_v10  ;;  %v1290_v52 = vcombine.low %v1065_v16, %v1067_v10  ;;  %v3340_v16 = vld [vmem:[%s4551_s6 + $0x198] sm:$0xff]   ;;  %v3342_v10 = vld [vmem:[%s4551_s6 + $0x1d0] sm:$0xff]  }
 0x2f9   :  { %1887 = vmatprep.mubr.bf16.mxu1 %v1329_v3  ;;  %v1298_v35 = vrot.slane %v1290_v52, %v3788_v9  ;;  %v3343_v3 = vld [vmem:[%s4551_s6 + $0x140] sm:$0xff]  }
 0x2fa   :  { %v1135_v12 = vpop.f32.mrf.mxu1  ;;  %1888 = vmatmul.mubr.bf16.vlgmr.msra.gmra.mxu1 %v1328_v13 }
 0x2fb   :  { %3132 = vmatpush3.bf16.msra.mxu1 %v3319_v4  ;;  %v1136_v30 = vadd.f32 %v1135_v12, %v966_v60  ;;  %v3344_v60 = vld [vmem:[%s4551_s6 + $0x190] sm:$0xff]   ;;  %v3346_v12 = vld [vmem:[%s4551_s6 + $0x1c8] sm:$0xff]  }
 0x2fc   :  { %v1137_v23 = vpop.f32.mrf.mxu1  ;;  %3133 = vmatprep.subr.bf16.mxu1 %v3320_v6  ;;  %v3345_v6 = vld [vmem:[%s4551_s6 + $0x100] sm:$0xff]  }
 0x2fd   :  { %v1138_v38 = vadd.f32 %v1137_v23, %v970_v7  ;;  %v1330_v46 = vpack.c.bf16 %v1136_v30, %v1136_v30  ;;  %v3348_v23 = vld [vmem:[%s4551_s6 + $0x1c0] sm:$0xff]  }
 0x2ff   :  { %v1291_v44 = vcombine.low %v1136_v30, %v1138_v38  ;;  %v1331_v42 = vpack.c.bf16 %v1138_v38, %v1138_v38  ;;  %3134 = vmatpush3.bf16.msra.mxu1 %v3321_v49  ;;  %v3347_v49 = vld [vmem:[%s4551_s6 + $0x188] sm:$0xff]   ;;  %v2074_v38 = vld [vmem:[%s4553_s8 + $0x1c0] sm:$0xff] }
 0x300   :  { %3135 = vmatprep.subr.bf16.mxu1 %v3323_v41  ;;  %v3349_v41 = vld [vmem:[%s4551_s6 + $0x180] sm:$0xff]  }
 0x301   :  { %1927 = vmatprep.mubr.bf16.mxu0 %v1331_v42  ;;  %v1305_v37 = vrot.slane %v1291_v44, %v3788_v9  ;;  %v2078_v44 = vld [vmem:[%s4553_s8 + $0x1e0] sm:$0xff]  ;;  %v2075_v42 = vld [vmem:[%s4553_s8 + $0x1c8] sm:$0xff] }
 0x302   :  { %v1206_v11 = vpop.f32.mrf.mxu1  ;;  %1928 = vmatmul.mubr.bf16.vlgmr.msra.gmra.mxu0 %v1330_v46  ;;  %v2079_v46 = vld [vmem:[%s4553_s8 + $0x1e8] sm:$0xff] }
 0x303   :  { %3154 = vmatpush3.bf16.msra.mxu0 %v3324_v21  ;;  %3136 = vmatpush3.bf16.msra.mxu1 %v3325_v22  ;;  %v1306_v19 = vcombine.low %v1298_v35, %v1305_v37  ;;  %v1207_v17 = vadd.f32 %v1206_v11, %v974_v50  ;;  %v2933_v21 = vcombine.low %v2074_v38, %v2078_v44  ;;  %v2067_v11 = vld [vmem:[%s4553_s8 + $0x188] sm:$0xff] }
 0x304   :  { %v1208_v0 = vpop.f32.mrf.mxu1  ;;  %3155 = vmatprep.subr.bf16.mxu0 %v3326_v28  ;;  %3137 = vmatprep.subr.bf16.mxu1 %v3327_v45  ;;  %v2934_v22 = vcombine.high %v2074_v38, %v2078_v44  ;;  %v2066_v28 = vld [vmem:[%s4553_s8 + $0x180] sm:$0xff]  ;;  %v2936_v35 = vcombine.high %v2075_v42, %v2079_v46 }
 0x305   :  { %v1209_v36 = vadd.f32 %v1208_v0, %v978_v25  ;;  %1326 = vst [vmem:[#allocation2] sm:$0xff] %v1306_v19  ;;  %v1332_v30 = vpack.c.bf16 %v1207_v17, %v1207_v17  ;;  %v2070_v45 = vld [vmem:[%s4553_s8 + $0x1a0] sm:$0xff]  ;;  %v2935_v25 = vcombine.low %v2075_v42, %v2079_v46 }
 0x306   :  { %v2926_v37 = vcombine.high %v2066_v28, %v2070_v45  ;;  %v2062_v0 = vld [vmem:[%s4553_s8 + $0x160] sm:$0xff] }
 0x307   :  { %v1333_v14 = vpack.c.bf16 %v1209_v36, %v1209_v36  ;;  %3156 = vmatpush3.bf16.msra.mxu0 %v3328_v47  ;;  %3138 = vmatpush3.bf16.msra.mxu1 %v3329_v27  ;;  %v1307_v58 = vcombine.low %v1207_v17, %v1209_v36  ;;  %v2071_v47 = vld [vmem:[%s4553_s8 + $0x1a8] sm:$0xff]  ;;  %v2058_v27 = vld [vmem:[%s4553_s8 + $0x140] sm:$0xff]  ;;  %v2925_v36 = vcombine.low %v2066_v28, %v2070_v45 }
 0x308   :  { %3157 = vmatprep.subr.bf16.mxu0 %v3330_v48  ;;  %3139 = vmatprep.subr.bf16.mxu1 %v3331_v24  ;;  %v2928_v19 = vcombine.high %v2067_v11, %v2071_v47  ;;  %v2059_v48 = vld [vmem:[%s4553_s8 + $0x148] sm:$0xff]  ;;  %v2927_v50 = vcombine.low %v2067_v11, %v2071_v47  ;;  %v2018_v42 = vld [vmem:[%s4553_s8] sm:$0xff]  ;;  %v2080_v11 = vld [vmem:[%s4553_s8 + $0x1f0] sm:$0xff] }
 0x309   :  { %1967 = vmatprep.mubr.bf16.mxu1 %v1333_v14  ;;  %v1315_v4 = vrot.slane %v1307_v58, %v3788_v9  ;;  %v2063_v24 = vld [vmem:[%s4553_s8 + $0x168] sm:$0xff]  ;;  %v2918_v14 = vcombine.high %v2058_v27, %v2062_v0  ;;  %v2077_v47 = vld [vmem:[%s4553_s8 + $0x1d8] sm:$0xff] }
 0x30a   :  { %v1277_v29 = vpop.f32.mrf.mxu1  ;;  %v2043_v58 = vld [vmem:[%s4553_s8 + $0xc8] sm:$0xff] }
 0x30b   :  { %3158 = vmatpush3.bf16.msra.mxu0 %v3332_v51  ;;  %3140 = vmatpush3.bf16.msra.mxu1 %v3333_v33  ;;  %v1278_v15 = vadd.f32 %v1277_v29, %v982_v59  ;;  %v2920_v51 = vcombine.high %v2059_v48, %v2063_v24  ;;  %v2050_v33 = vld [vmem:[%s4553_s8 + $0x100] sm:$0xff]  ;;  %v2055_v59 = vld [vmem:[%s4553_s8 + $0x128] sm:$0xff]  ;;  %v2919_v29 = vcombine.low %v2059_v48, %v2063_v24 }
 0x30c   :  { %v1279_v34 = vpop.f32.mrf.mxu1  ;;  %3159 = vmatprep.subr.bf16.mxu0 %v3334_v54  ;;  %3141 = vmatprep.subr.bf16.mxu1 %v3335_v43  ;;  %v2054_v54 = vld [vmem:[%s4553_s8 + $0x120] sm:$0xff]  ;;  %v2051_v43 = vld [vmem:[%s4553_s8 + $0x108] sm:$0xff] }
 0x30d   :  { %v1280_v32 = vadd.f32 %v1279_v34, %v986_v26  ;;  %v1334_v52 = vpack.c.bf16 %v1278_v15, %v1278_v15  ;;  %v2917_v26 = vcombine.low %v2058_v27, %v2062_v0  ;;  %v2910_v17 = vcombine.high %v2050_v33, %v2054_v54  ;;  %v2023_v28 = vld [vmem:[%s4553_s8 + $0x28] sm:$0xff] }
 0x30e   :  { %v2911_v34 = vcombine.low %v2051_v43, %v2055_v59 }
 0x30f   :  { %v1308_v62 = vcombine.low %v1278_v15, %v1280_v32  ;;  %v1335_v63 = vpack.c.bf16 %v1280_v32, %v1280_v32  ;;  %3160 = vmatpush3.bf16.msra.mxu0 %v3336_v53  ;;  %3142 = vmatpush3.bf16.msra.mxu1 %v3337_v55  ;;  %v2912_v53 = vcombine.high %v2051_v43, %v2055_v59 }
 0x310   :  { %3161 = vmatprep.subr.bf16.mxu0 %v3338_v18  ;;  %3143 = vmatprep.subr.bf16.mxu1 %v3339_v57  ;;  %v2909_v55 = vcombine.low %v2050_v33, %v2054_v54  ;;  %v2042_v18 = vld [vmem:[%s4553_s8 + $0xc0] sm:$0xff] }
 0x311   :  { %2007 = vmatprep.mubr.bf16.mxu0 %v1335_v63  ;;  %v1322_v13 = vrot.slane %v1308_v62, %v3788_v9  ;;  %v2046_v57 = vld [vmem:[%s4553_s8 + $0xe0] sm:$0xff]  ;;  %v2047_v62 = vld [vmem:[%s4553_s8 + $0xe8] sm:$0xff] }
 0x312   :  { %v2901_v15 = vcombine.low %v2042_v18, %v2046_v57  ;;  %v2902_v32 = vcombine.high %v2042_v18, %v2046_v57  ;;  %v2903_v63 = vcombine.low %v2043_v58, %v2047_v62 }
 0x313   :  { %3162 = vmatpush3.bf16.msra.mxu0 %v3340_v16  ;;  %3144 = vmatpush3.bf16.msra.mxu1 %v3341_v1  ;;  %v1323_v7 = vcombine.low %v1315_v4, %v1322_v13  ;;  %v2904_v16 = vcombine.high %v2043_v58, %v2047_v62  ;;  %v2034_v1 = vld [vmem:[%s4553_s8 + $0x80] sm:$0xff]  ;;  %v2039_v13 = vld [vmem:[%s4553_s8 + $0xa8] sm:$0xff] }
 0x314   :  { %3163 = vmatprep.subr.bf16.mxu0 %v3342_v10  ;;  %3145 = vmatprep.subr.bf16.mxu1 %v3343_v3  ;;  %v2038_v10 = vld [vmem:[%s4553_s8 + $0xa0] sm:$0xff]  ;;  %v2035_v3 = vld [vmem:[%s4553_s8 + $0x88] sm:$0xff] }
 0x315   :  { %1327 = vst [vmem:[#allocation2 + $0x8] sm:$0xff] %v1323_v7  ;;  %v2894_v4 = vcombine.high %v2034_v1, %v2038_v10  ;;  %v2896_v7 = vcombine.high %v2035_v3, %v2039_v13 }
 0x317   :  { %3164 = vmatpush3.bf16.msra.mxu0 %v3344_v60  ;;  %3146 = vmatpush3.bf16.msra.mxu1 %v3345_v6  ;;  %v2893_v60 = vcombine.low %v2034_v1, %v2038_v10  ;;  %v2895_v6 = vcombine.low %v2035_v3, %v2039_v13 }
 0x318   :  { %3165 = vmatprep.subr.bf16.mxu0 %v3346_v12  ;;  %2444 = vmatprep.subr.bf16.mxu1 %v2934_v22  ;;  %v2026_v12 = vld [vmem:[%s4553_s8 + $0x40] sm:$0xff]  ;;  %v2019_v22 = vld [vmem:[%s4553_s8 + $0x8] sm:$0xff] }
 0x31a   :  { %1968 = vmatmul.mubr.bf16.vlgmr.msra.gmra.mxu1 %v1332_v30  ;;  %v2027_v30 = vld [vmem:[%s4553_s8 + $0x48] sm:$0xff] }
 0x31b   :  { %3166 = vmatpush3.bf16.msra.mxu0 %v3347_v49  ;;  %2445 = vmatpush1.bf16.msra.mxu1 %v2933_v21  ;;  %v2030_v49 = vld [vmem:[%s4553_s8 + $0x60] sm:$0xff] }
 0x31c   :  { %3167 = vmatprep.subr.bf16.mxu0 %v3348_v23  ;;  %2446 = vmatprep.subr.bf16.mxu1 %v2926_v37  ;;  %v2886_v23 = vcombine.high %v2026_v12, %v2030_v49  ;;  %v2022_v21 = vld [vmem:[%s4553_s8 + $0x20] sm:$0xff]  ;;  %v2076_v37 = vld [vmem:[%s4553_s8 + $0x1d0] sm:$0xff] }
 0x31d   :  { %v2878_v46 = vcombine.high %v2018_v42, %v2022_v21  ;;  %v2877_v45 = vcombine.low %v2018_v42, %v2022_v21  ;;  %v2938_v27 = vcombine.high %v2076_v37, %v2080_v11  ;;  %v2937_v0 = vcombine.low %v2076_v37, %v2080_v11 }
 0x31f   :  { %3168 = vmatpush3.bf16.msra.mxu0 %v3349_v41  ;;  %2447 = vmatpush1.bf16.msra.mxu1 %v2925_v36  ;;  %v2031_v41 = vld [vmem:[%s4553_s8 + $0x68] sm:$0xff]  ;;  %v3448_v36 = vmov 0  }
 0x320   :  { %2485 = vmatprep.subr.bf16.mxu0 %v2936_v35  ;;  %2448 = vmatprep.subr.bf16.mxu1 %v2918_v14  ;;  %v2887_v38 = vcombine.low %v2027_v30, %v2031_v41  ;;  %v2888_v44 = vcombine.high %v2027_v30, %v2031_v41  ;;  %v2880_v35 = vcombine.high %v2019_v22, %v2023_v28  ;;  %v2060_v41 = vld [vmem:[%s4553_s8 + $0x150] sm:$0xff] }
 0x321   :  { %2476 = vmatprep.mubr.bf16.mxu1 %v3448_v36 }
 0x322   :  { %2008 = vmatmul.mubr.bf16.vlgmr.msra.gmra.mxu0 %v1334_v52  ;;  %v2885_v52 = vcombine.low %v2026_v12, %v2030_v49 }
 0x323   :  { %2486 = vmatpush1.bf16.msra.mxu0 %v2935_v25  ;;  %2449 = vmatpush1.bf16.msra.mxu1 %v2917_v26  ;;  %v2879_v25 = vcombine.low %v2019_v22, %v2023_v28  ;;  %v2052_v28 = vld [vmem:[%s4553_s8 + $0x110] sm:$0xff] }
 0x324   :  { %2487 = vmatprep.subr.bf16.mxu0 %v2928_v19  ;;  %2450 = vmatprep.subr.bf16.mxu1 %v2910_v17  ;;  %v2081_v19 = vld [vmem:[%s4553_s8 + $0x1f8] sm:$0xff] }
 0x325   :  { %v2939_v48 = vcombine.low %v2077_v47, %v2081_v19  ;;  %v2940_v24 = vcombine.high %v2077_v47, %v2081_v19  ;;  %2517 = vmatprep.mubr.bf16.mxu0 %v3448_v36  ;;  %v2044_v19 = vld [vmem:[%s4553_s8 + $0xd0] sm:$0xff] }
 0x327   :  { %2488 = vmatpush1.bf16.msra.mxu0 %v2927_v50  ;;  %2451 = vmatpush1.bf16.msra.mxu1 %v2909_v55  ;;  %v2812_v55 = vld [vmem:[%s4552_s7] ss:$0 sm:$0xff] }
 0x328   :  { %2489 = vmatprep.subr.bf16.mxu0 %v2920_v51  ;;  %2452 = vmatprep.subr.bf16.mxu1 %v2902_v32 }
 0x32b   :  { %2490 = vmatpush1.bf16.msra.mxu0 %v2919_v29  ;;  %2453 = vmatpush1.bf16.msra.mxu1 %v2901_v15 }
 0x32c   :  { %2491 = vmatprep.subr.bf16.mxu0 %v2912_v53  ;;  %2454 = vmatprep.subr.bf16.mxu1 %v2894_v4  ;;  %v2068_v4 = vld [vmem:[%s4553_s8 + $0x190] sm:$0xff] }
 0x32f   :  { %2492 = vmatpush1.bf16.msra.mxu0 %v2911_v34  ;;  %2455 = vmatpush1.bf16.msra.mxu1 %v2893_v60  ;;  %v2072_v60 = vld [vmem:[%s4553_s8 + $0x1b0] sm:$0xff] }
 0x330   :  { %2493 = vmatprep.subr.bf16.mxu0 %v2904_v16  ;;  %2456 = vmatprep.subr.bf16.mxu1 %v2886_v23  ;;  %v2930_v30 = vcombine.high %v2068_v4, %v2072_v60  ;;  %v2929_v42 = vcombine.low %v2068_v4, %v2072_v60 }
 0x333   :  { %2494 = vmatpush1.bf16.msra.mxu0 %v2903_v63  ;;  %2457 = vmatpush1.bf16.msra.mxu1 %v2885_v52  ;;  %v2064_v52 = vld [vmem:[%s4553_s8 + $0x170] sm:$0xff] }
 0x334   :  { %2495 = vmatprep.subr.bf16.mxu0 %v2896_v7  ;;  %2458 = vmatprep.subr.bf16.mxu1 %v2878_v46  ;;  %v2073_v7 = vld [vmem:[%s4553_s8 + $0x1b8] sm:$0xff]  ;;  %v2922_v22 = vcombine.high %v2060_v41, %v2064_v52  ;;  %v2921_v37 = vcombine.low %v2060_v41, %v2064_v52 }
 0x337   :  { %2496 = vmatpush1.bf16.msra.mxu0 %v2895_v6  ;;  %2459 = vmatpush1.bf16.msra.mxu1 %v2877_v45  ;;  %v2069_v6 = vld [vmem:[%s4553_s8 + $0x198] sm:$0xff]  ;;  %v2056_v45 = vld [vmem:[%s4553_s8 + $0x130] sm:$0xff] }
 0x338   :  { %2497 = vmatprep.subr.bf16.mxu0 %v2888_v44  ;;  %2526 = vmatprep.subr.bf16.mxu1 %v2938_v27  ;;  %v2932_v23 = vcombine.high %v2069_v6, %v2073_v7  ;;  %v2065_v44 = vld [vmem:[%s4553_s8 + $0x178] sm:$0xff]  ;;  %v2931_v21 = vcombine.low %v2069_v6, %v2073_v7  ;;  %v2914_v47 = vcombine.high %v2052_v28, %v2056_v45 }
 0x33b   :  { %2498 = vmatpush1.bf16.msra.mxu0 %v2887_v38  ;;  %v2061_v38 = vld [vmem:[%s4553_s8 + $0x158] sm:$0xff] }
 0x33c   :  { %2499 = vmatprep.subr.bf16.mxu0 %v2880_v35  ;;  %v2924_v46 = vcombine.high %v2061_v38, %v2065_v44  ;;  %v2057_v35 = vld [vmem:[%s4553_s8 + $0x138] sm:$0xff]  ;;  %v2923_v11 = vcombine.low %v2061_v38, %v2065_v44 }
 0x33f   :  { %2500 = vmatpush1.bf16.msra.mxu0 %v2879_v25  ;;  %v2053_v25 = vld [vmem:[%s4553_s8 + $0x118] sm:$0xff] }
 0x340   :  { %2567 = vmatprep.subr.bf16.mxu0 %v2940_v24  ;;  %v2916_v27 = vcombine.high %v2053_v25, %v2057_v35  ;;  %v2049_v24 = vld [vmem:[%s4553_s8 + $0xf8] sm:$0xff] }
 0x3ba   :  { %v3103_v50 = vpop.f32.mrf.mxu1 }
 0x3bc   :  { %v3104_v14 = vpop.f32.mrf.mxu1 }
 0x3bd   :  { %v3105_v53 = vadd.f32 %v3104_v14, %v3103_v50  ;;  %v2915_v50 = vcombine.low %v2053_v25, %v2057_v35 }
 0x3be   :  { %v3106_v51 = vpop.f32.mrf.mxu1 }
 0x3bf   :  { %v1890_v58 = vadd.f32 %v3105_v53, %v2812_v55  ;;  %v2028_v55 = vld [vmem:[%s4553_s8 + $0x50] sm:$0xff] }
 0x3c0   :  { %v3107_v33 = vpop.f32.mrf.mxu1 }
 0x3c1   :  { %v2036_v33 = vld [vmem:[%s4553_s8 + $0x90] sm:$0xff] }
 0x3c2   :  { %v3125_v54 = vpop.f32.mrf.mxu0 }
 0x3c4   :  { %v3126_v43 = vpop.f32.mrf.mxu0 }
 0x3c5   :  { %v3127_v18 = vadd.f32 %v3126_v43, %v3125_v54  ;;  %v2040_v54 = vld [vmem:[%s4553_s8 + $0xb0] sm:$0xff]  ;;  %v2037_v43 = vld [vmem:[%s4553_s8 + $0x98] sm:$0xff] }
 0x3c6   :  { %v3128_v59 = vpop.f32.mrf.mxu0 }
 0x3c7   :  { %v1930_v62 = vadd.f32 %v3127_v18, %v1890_v58  ;;  %v2041_v59 = vld [vmem:[%s4553_s8 + $0xb8] sm:$0xff]  ;;  %v2897_v58 = vcombine.low %v2036_v33, %v2040_v54 }
 0x3c8   :  { %v3129_v26 = vpop.f32.mrf.mxu0  ;;  %v2900_v53 = vcombine.high %v2037_v43, %v2041_v59  ;;  %v2029_v18 = vld [vmem:[%s4553_s8 + $0x58] sm:$0xff] }
 0x3da   :  { %v3147_v29 = vpop.f32.mrf.mxu1 }
 0x3dc   :  { %v3148_v17 = vpop.f32.mrf.mxu1 }
 0x3dd   :  { %v3149_v15 = vadd.f32 %v3148_v17, %v3147_v29  ;;  %v2898_v17 = vcombine.high %v2036_v33, %v2040_v54 }
 0x3de   :  { %v3150_v34 = vpop.f32.mrf.mxu1 }
 0x3df   :  { %v1970_v16 = vadd.f32 %v3149_v15, %v1930_v62  ;;  %v2032_v34 = vld [vmem:[%s4553_s8 + $0x70] sm:$0xff]  ;;  %v2899_v15 = vcombine.low %v2037_v43, %v2041_v59 }
 0x3e0   :  { %v3151_v57 = vpop.f32.mrf.mxu1 }
 0x3e1   :  { %v2033_v57 = vld [vmem:[%s4553_s8 + $0x78] sm:$0xff] }
 0x3e2   :  { %v3169_v32 = vpop.f32.mrf.mxu0  ;;  %v2892_v62 = vcombine.high %v2029_v18, %v2033_v57  ;;  %v2891_v4 = vcombine.low %v2029_v18, %v2033_v57 }
 0x3e4   :  { %v3170_v63 = vpop.f32.mrf.mxu0 }
 0x3e5   :  { %v3171_v1 = vadd.f32 %v3170_v63, %v3169_v32  ;;  %v2890_v32 = vcombine.high %v2028_v55, %v2032_v34  ;;  %v2020_v63 = vld [vmem:[%s4553_s8 + $0x10] sm:$0xff] }
 0x3e6   :  { %v3172_v10 = vpop.f32.mrf.mxu0 }
 0x3e7   :  { %v2010_v3 = vadd.f32 %v3171_v1, %v1970_v16  ;;  %v2024_v16 = vld [vmem:[%s4553_s8 + $0x30] sm:$0xff]  ;;  %v2021_v1 = vld [vmem:[%s4553_s8 + $0x18] sm:$0xff] }
 0x3e8   :  { %v3173_v13 = vpop.f32.mrf.mxu0  ;;  %v2025_v10 = vld [vmem:[%s4553_s8 + $0x38] sm:$0xff]  ;;  %v2881_v6 = vcombine.low %v2020_v63, %v2024_v16 }
 0x3e9   :  { %v2015_v12 = vmax.f32 %v2010_v3, 0.0  ;;  %v2889_v3 = vcombine.low %v2028_v55, %v2032_v34  ;;  %v2882_v13 = vcombine.high %v2020_v63, %v2024_v16  ;;  %v2884_v60 = vcombine.high %v2021_v1, %v2025_v10 }
 0x3ea   :  { %v2883_v7 = vcombine.low %v2021_v1, %v2025_v10 }
 0x3eb   :  { %v4435_v49 = vpack.c.bf16 %v2015_v12, %v2015_v12  ;;  %2016 = vst [vmem:[#allocation4] sm:$0x3] %v2015_v12 }
 0x3ed   :  { %2477 = vmatmul.mubr.bf16.vlgmr.msra.gmra.mxu1 %v4435_v49  ;;  %2518 = vmatmul.mubr.bf16.vlgmr.msra.gmra.mxu0 %v4435_v49 }
 0x3ee   :  { %2527 = vmatpush1.bf16.msra.mxu1 %v2937_v0  ;;  %2568 = vmatpush1.bf16.msra.mxu0 %v2939_v48  ;;  %v2048_v0 = vld [vmem:[%s4553_s8 + $0xf0] sm:$0xff]  ;;  %v2045_v48 = vld [vmem:[%s4553_s8 + $0xd8] sm:$0xff]  ;;  %s3449_s8 = smov [#allocation4]  }
 0x3ef   :  { %2528 = vmatprep.subr.bf16.mxu1 %v2930_v30  ;;  %2569 = vmatprep.subr.bf16.mxu0 %v2932_v23  ;;  %v2906_v14 = vcombine.high %v2044_v19, %v2048_v0  ;;  %v2908_v51 = vcombine.high %v2045_v48, %v2049_v24  ;;  %v2905_v26 = vcombine.low %v2044_v19, %v2048_v0  ;;  %s2718_s7 = sshll.u32 %s3449_s8, 4  ;;  %s2719_s7 = int_to_ptr.vmem [resolvable:$true] %s2718_s7 }
 0x3f0   :  { %2558 = vmatprep.mubr.bf16.mxu1 %v3448_v36  ;;  %2599 = vmatprep.mubr.bf16.mxu0 %v3448_v36  ;;  %v2913_v36 = vcombine.low %v2052_v28, %v2056_v45  ;;  %v2907_v29 = vcombine.low %v2045_v48, %v2049_v24  ;;  %s3382_s21 = scalar_lea.vmem %s2719_s7, 32  ;;  %p3387_p1 = scmp.lt.s32.totalorder %s2719_s7, %s2719_s7 }
 0x3f1   :  { %p3383_p0 = scmp.ne.s32.totalorder %s2719_s7, %s3382_s21  ;;  %p3388_p2 = scmp.lt.s32.totalorder %s3382_s21, %s3382_s21 }
 0x3f2   :  { %2529 = vmatpush1.bf16.msra.mxu1 %v2929_v42  ;;  %2570 = vmatpush1.bf16.msra.mxu0 %v2931_v21 }
 0x3f3   :  { %2530 = vmatprep.subr.bf16.mxu1 %v2922_v22  ;;  %2571 = vmatprep.subr.bf16.mxu0 %v2924_v46  ;;  %p3389_p3 = por %p3388_p2, %p3387_p1 }
 0x3f5   :  { %p3390_p4 = pnand %p3389_p3, %p3383_p0 }
 0x3f6   :  { %2531 = vmatpush1.bf16.msra.mxu1 %v2921_v37  ;;  %2572 = vmatpush1.bf16.msra.mxu0 %v2923_v11 }
 0x3f7   :  { %2532 = vmatprep.subr.bf16.mxu1 %v2914_v47  ;;  %2573 = vmatprep.subr.bf16.mxu0 %v2916_v27 }
 0x3fa   :  { %2533 = vmatpush1.bf16.msra.mxu1 %v2913_v36  ;;  %2574 = vmatpush1.bf16.msra.mxu0 %v2915_v50 }
 0x3fb   :  { %2534 = vmatprep.subr.bf16.mxu1 %v2906_v14  ;;  %2575 = vmatprep.subr.bf16.mxu0 %v2908_v51 }
 0x3fe   :  { %2535 = vmatpush1.bf16.msra.mxu1 %v2905_v26  ;;  %2576 = vmatpush1.bf16.msra.mxu0 %v2907_v29 }
 0x3ff   :  { %2536 = vmatprep.subr.bf16.mxu1 %v2898_v17  ;;  %2577 = vmatprep.subr.bf16.mxu0 %v2900_v53 }
 0x402   :  { %2537 = vmatpush1.bf16.msra.mxu1 %v2897_v58  ;;  %2578 = vmatpush1.bf16.msra.mxu0 %v2899_v15 }
 0x403   :  { %2538 = vmatprep.subr.bf16.mxu1 %v2890_v32  ;;  %2579 = vmatprep.subr.bf16.mxu0 %v2892_v62 }
 0x406   :  { %2539 = vmatpush1.bf16.msra.mxu1 %v2889_v3  ;;  %2580 = vmatpush1.bf16.msra.mxu0 %v2891_v4 }
 0x407   :  { %2540 = vmatprep.subr.bf16.mxu1 %v2882_v13  ;;  %2581 = vmatprep.subr.bf16.mxu0 %v2884_v60 }
 0x40a   :  { %2541 = vmatpush1.bf16.msra.mxu1 %v2881_v6  ;;  %2582 = vmatpush1.bf16.msra.mxu0 %v2883_v7 }
 0x40d   :  { %2559 = vmatmul.mubr.bf16.vlgmr.msra.gmra.mxu1 %v4435_v49  ;;  %2600 = vmatmul.mubr.bf16.vlgmr.msra.gmra.mxu0 %v4435_v49 }
 0x40e   :  { %3393 = shalt.err (!%p3390_p4)
}
 0x40f   :  { %2721 = dma.vmem_to_hbm [thread:$0]  %s2719_s7, 32, %s4556_s11, [#allocation5]  }
 0x410   :  { %s3402_s23 = scalar_lea.vmem %s2709_s20, 256  ;;  %p3407_p6 = scmp.lt.s32.totalorder %s2709_s20, %s2709_s20 }
 0x411   :  { %p3403_p5 = scmp.ne.s32.totalorder %s2709_s20, %s3402_s23  ;;  %p3408_p7 = scmp.lt.s32.totalorder %s3402_s23, %s3402_s23 }
 0x413   :  { %p3409_p8 = por %p3408_p7, %p3407_p6 }
 0x415   :  { %p3410_p9 = pnand %p3409_p8, %p3403_p5 }
 0x417   :  { %3413 = shalt.err (!%p3410_p9)
}
 0x418   :  { %2711 = dma.vmem_to_hbm [thread:$0]  %s2709_s20, 256, %s4555_s10, [#allocation3]   ;;  %v2082_v12 = vld [vmem:[%s4554_s9] sm:$0xff] }
 0x419   :  { %v2087_v49 = vrot.slane %v2082_v12, %v957_v31  ;;  %v2095_v30 = vrot.slane %v2082_v12, %v965_v2  ;;  %v2091_v23 = vrot.slane %v2082_v12, %v961_v61  ;;  %v2099_v41 = vrot.slane %v2082_v12, %v969_v56  ;;  %s3451_s9 = smov [#allocation6]  }
 0x41a   :  { %v2103_v50 = vrot.slane %v2082_v12, %v973_v39  ;;  %v2111_v14 = vrot.slane %v2082_v12, %v981_v5  ;;  %v2107_v51 = vrot.slane %v2082_v12, %v977_v40  ;;  %v2115_v33 = vrot.slane %v2082_v12, %v985_v20  ;;  %s2728_s10 = sshll.u32 %s3451_s9, 4  ;;  %s2729_s10 = int_to_ptr.vmem [resolvable:$true] %s2728_s10 }
 0x41b   :  { %s3422_s11 = scalar_lea.vmem %s2729_s10, 256  ;;  %p3427_p11 = scmp.lt.s32.totalorder %s2729_s10, %s2729_s10 }
 0x41c   :  { %p3423_p10 = scmp.ne.s32.totalorder %s2729_s10, %s3422_s11  ;;  %p3428_p12 = scmp.lt.s32.totalorder %s3422_s11, %s3422_s11 }
 0x41e   :  { %p3429_p13 = por %p3428_p12, %p3427_p11 }
 0x420   :  { %p3430_p0 = pnand %p3429_p13, %p3423_p10 }
 0x4ad   :  { %v2478_v52 = vpop.f32.mrf.mxu1  ;;  %v2519_v38 = vpop.f32.mrf.mxu0 }
 0x4ae   :  { %v2479_v44 = vadd.f32 %v2478_v52, %v2087_v49  ;;  %v2520_v42 = vadd.f32 %v2519_v38, %v2095_v30 }
 0x4af   :  { %v2480_v21 = vpop.f32.mrf.mxu1  ;;  %v2521_v22 = vpop.f32.mrf.mxu0 }
 0x4b0   :  { %v2941_v46 = vmul.f32 -1.442695, %v2479_v44  ;;  %v2943_v28 = vmul.f32 -1.442695, %v2520_v42  ;;  %v2481_v45 = vadd.f32 %v2480_v21, %v2091_v23  ;;  %v2522_v25 = vadd.f32 %v2521_v22, %v2099_v41 }
 0x4b1   :  { %v2482_v31 = vpop.f32.mrf.mxu1  ;;  %v2523_v35 = vpop.f32.mrf.mxu0 }
 0x4b2   :  { %3350 = vpow2.f32 %v2941_v46  ;;  %v2942_v2 = vmul.f32 -1.442695, %v2481_v45  ;;  %v2944_v37 = vmul.f32 -1.442695, %v2522_v25 }
 0x4b3   :  { %3352 = vpow2.f32 %v2943_v28  ;;  %v2483_v61 = vpop.f32.mrf.mxu1  ;;  %v2524_v11 = vpop.f32.mrf.mxu0 }
 0x4b4   :  { %3354 = vpow2.f32 %v2942_v2 }
 0x4b5   :  { %3356 = vpow2.f32 %v2944_v37 }
 0x4bf   :  { %v3351_v56 = vpop.eup %3350 }
 0x4c0   :  { %v3353_v47 = vpop.eup %3352  ;;  %v2632_v27 = vadd.f32 1.0, %v3351_v56 }
 0x4c1   :  { %v3355_v19 = vpop.eup %3354  ;;  %v2634_v0 = vadd.f32 1.0, %v3353_v47 }
 0x4c2   :  { %v3357_v48 = vpop.eup %3356  ;;  %3358 = vrcp.f32 %v2632_v27  ;;  %v2633_v24 = vadd.f32 1.0, %v3355_v19 }
 0x4c3   :  { %3360 = vrcp.f32 %v2634_v0  ;;  %v2635_v36 = vadd.f32 1.0, %v3357_v48 }
 0x4c4   :  { %3362 = vrcp.f32 %v2633_v24 }
 0x4c5   :  { %3364 = vrcp.f32 %v2635_v36 }
 0x4cd   :  { %v2560_v54 = vpop.f32.mrf.mxu1  ;;  %v2601_v43 = vpop.f32.mrf.mxu0 }
 0x4ce   :  { %v2561_v59 = vadd.f32 %v2560_v54, %v2103_v50  ;;  %v2602_v26 = vadd.f32 %v2601_v43, %v2111_v14 }
 0x4cf   :  { %v3359_v29 = vpop.eup %3358  ;;  %v2562_v17 = vpop.f32.mrf.mxu1 }
 0x4d0   :  { %v2603_v53 = vpop.f32.mrf.mxu0  ;;  %v3361_v55 = vpop.eup %3360  ;;  %v2945_v34 = vmul.f32 -1.442695, %v2561_v59  ;;  %v2947_v18 = vmul.f32 -1.442695, %v2602_v26  ;;  %v2563_v39 = vadd.f32 %v2562_v17, %v2107_v51 }
 0x4d1   :  { %v2604_v57 = vadd.f32 %v2603_v53, %v2115_v33  ;;  %v3363_v58 = vpop.eup %3362  ;;  %v2564_v5 = vpop.f32.mrf.mxu1 }
 0x4d2   :  { %v2605_v15 = vpop.f32.mrf.mxu0  ;;  %v3365_v32 = vpop.eup %3364  ;;  %3366 = vpow2.f32 %v2945_v34  ;;  %v2946_v40 = vmul.f32 -1.442695, %v2563_v39  ;;  %v2664_v20 = vcombine.low %v3359_v29, %v3363_v58 }
 0x4d3   :  { %v2948_v8 = vmul.f32 -1.442695, %v2604_v57  ;;  %3368 = vpow2.f32 %v2947_v18  ;;  %v2565_v62 = vpop.f32.mrf.mxu1  ;;  %v2665_v16 = vcombine.low %v3361_v55, %v3365_v32 }
 0x4d4   :  { %v2606_v63 = vpop.f32.mrf.mxu0  ;;  %3370 = vpow2.f32 %v2946_v40  ;;  %v2672_v1 = vrot.slane %v2664_v20, %v3788_v9 }
 0x4d5   :  { %3372 = vpow2.f32 %v2948_v8  ;;  %v2679_v10 = vrot.slane %v2665_v16, %v3788_v9 }
 0x4d7   :  { %v2680_v3 = vcombine.low %v2672_v1, %v2679_v10 }
 0x4d9   :  { %2700 = vst [vmem:[#allocation6] sm:$0xff] %v2680_v3 }
 0x4df   :  { %v3367_v4 = vpop.eup %3366 }
 0x4e0   :  { %v3369_v13 = vpop.eup %3368  ;;  %v2636_v60 = vadd.f32 1.0, %v3367_v4 }
 0x4e1   :  { %v3371_v6 = vpop.eup %3370  ;;  %v2638_v7 = vadd.f32 1.0, %v3369_v13 }
 0x4e2   :  { %v3373_v12 = vpop.eup %3372  ;;  %3374 = vrcp.f32 %v2636_v60  ;;  %v2637_v49 = vadd.f32 1.0, %v3371_v6 }
 0x4e3   :  { %3376 = vrcp.f32 %v2638_v7  ;;  %v2639_v30 = vadd.f32 1.0, %v3373_v12 }
 0x4e4   :  { %3378 = vrcp.f32 %v2637_v49 }
 0x4e5   :  { %3380 = vrcp.f32 %v2639_v30 }
 0x4ef   :  { %v3375_v23 = vpop.eup %3374 }
 0x4f0   :  { %v3377_v41 = vpop.eup %3376 }
 0x4f1   :  { %v3379_v52 = vpop.eup %3378 }
 0x4f2   :  { %v3381_v38 = vpop.eup %3380  ;;  %v2681_v44 = vcombine.low %v3375_v23, %v3379_v52 }
 0x4f3   :  { %v2682_v42 = vcombine.low %v3377_v41, %v3381_v38 }
 0x4f4   :  { %v2689_v21 = vrot.slane %v2681_v44, %v3788_v9 }
 0x4f5   :  { %v2696_v22 = vrot.slane %v2682_v42, %v3788_v9 }
 0x4f7   :  { %v2697_v46 = vcombine.low %v2689_v21, %v2696_v22 }
 0x4f9   :  { %2701 = vst [vmem:[#allocation6 + $0x8] sm:$0xff] %v2697_v46 }
 0x4fa   :  { %3433 = shalt.err (!%p3430_p0)
}
 0x4fb   :  { %2731 = dma.vmem_to_hbm [thread:$0]  %s2729_s10, 256, %s4557_s12, [#allocation5]  }
 0x4fc   :  { %3442 = dma.done.wait [#allocation3], 256  }
 0x4fd   :  { %3443 = vsyncadd [#allocation3], 4294967040 }
 0x4fe   :  { %3444 = dma.done.wait [#allocation5], 288  }
 0x4ff   :  { %3445 = vsyncadd [#allocation5], 4294967008 }
 0x500   :  { %2741 = vsyncpa [#allocation3], 1 }
 0x501   :  { %2742 = vsyncpa [#allocation5], 1 }

</bundles_post_ra>
